<compile_context>
chip_gen: v7x
topology: tpu7x:2x2x1
jax: 0.10.0
libtpu: 0.0.40
codegen_flags: <defaults>
</compile_context>

<pallas_src>
import functools

import jax
import jax.numpy as jnp
from jax import lax
from jax.experimental import pallas as pl
from jax.experimental.pallas import tpu as pltpu


# ------------------------------- kernel -------------------------------------
def _gnn_layer_kernel(src_ref, dst_ref, state_ref, c_ref, feat_term_ref,
                      w1s_ref, w2_ref, b2_ref, wih_ref, whh_ref, bg_ref,
                      new_h_ref, new_c_ref, *, num_prop, msg_dim,
                      apply_input_relu):
    """One GNN layer: `num_prop` propagation steps, fully VMEM-resident."""
    M = src_ref.shape[0]
    N = state_ref.shape[0]

    # Gather/scatter operators are fixed across prop steps -> build once.
    # signed one-hot: a single (M,N)@(N,H) matmul yields state[src]-state[dst].
    iota_n = lax.broadcasted_iota(jnp.int32, (M, N), 1)
    onehot_dst = (iota_n == dst_ref[...]).astype(jnp.float32)          # (M, N)
    signed = (iota_n == src_ref[...]).astype(jnp.float32) - onehot_dst
    # {-1,0,+1} is exact in bf16 -> full-rate MXU path, f32 accumulation.
    signed_bf = signed.astype(jnp.bfloat16)
    dst_bf = onehot_dst.astype(jnp.bfloat16)

    state = state_ref[...]                    # (N, H) f32
    c = c_ref[...]                            # (N, H) f32
    if apply_input_relu:                      # F.relu between layers (ii > 0)
        state = jnp.maximum(state, 0.0)

    feat_term = feat_term_ref[...]            # (M, msg+att) precomputed
    w1s = w1s_ref[...]                        # (H, msg+att) state rows of fused layer-1
    w2 = w2_ref[...]                          # (msg+att, 2*msg) block-diag fused layer-2
    b2 = b2_ref[...]                          # (1, 2*msg)

    # num_prop is a small static int -> unrolled Python loop, everything stays
    # in vregs/VMEM between steps.
    for _ in range(num_prop):
        # gather + diff via one signed-one-hot matmul (bf16 operands, f32 acc)
        state_diff = jnp.dot(signed_bf, state.astype(jnp.bfloat16),
                             preferred_element_type=jnp.float32)       # (M, H)

        # fused msg/att first layer; edge/dist-feature contribution + bias were
        # precomputed in the wrapper (no lane concat in-kernel).
        h1 = jnp.maximum(
            jnp.dot(state_diff, w1s, preferred_element_type=jnp.float32)
            + feat_term, 0.0)                                           # (M, msg+att)

        # fused block-diagonal second layer -> [msg_pre | att_logit]
        out2 = jnp.dot(h1, w2, preferred_element_type=jnp.float32) + b2
        msg = out2[:, :msg_dim] * jax.nn.sigmoid(out2[:, msg_dim:])     # (M, msg)

        # scatter-add over destination nodes: onehot_dst^T @ msg (bf16, f32 acc)
        state_msg = lax.dot_general(
            dst_bf, msg.astype(jnp.bfloat16),
            dimension_numbers=(((0,), (0,)), ((), ())),
            preferred_element_type=jnp.float32)                         # (N, msg)

        # LSTMCell (PyTorch gate order i,f,g,o). Weights were split per gate in
        # the wrapper so each gate pre-activation is lane-aligned with state/c
        # (no sub-128-lane slicing of a fused (N,4H) gate tensor).
        pre = []
        for g in range(4):
            pre.append(
                jnp.dot(state_msg, wih_ref[g], preferred_element_type=jnp.float32)
                + jnp.dot(state, whh_ref[g], preferred_element_type=jnp.float32)
                + bg_ref[g])
        i_g = jax.nn.sigmoid(pre[0])
        f_g = jax.nn.sigmoid(pre[1])
        g_g = jnp.tanh(pre[2])
        o_g = jax.nn.sigmoid(pre[3])
        c = f_g * c + i_g * g_g
        state = o_g * jnp.tanh(c)

    new_h_ref[...] = state
    new_c_ref[...] = c


# ------------------------------- wrapper -------------------------------------
def _prep_layer(p, edge_feat, dist_feat, node_state_dim):
    """Per-layer weight preprocessing (plain JAX, once per layer)."""
    (w1, b1, w2, b2, a1, ab1, a2, ab2, wih, bih, whh, bhh) = p
    H = node_state_dim
    msg_dim = w2.shape[0]
    att_hidden = a2.shape[0]

    # Fuse msg/att first layers column-wise; split rows into the state part
    # (kept for the kernel) and the edge/dist-feature part, whose contribution
    # (plus bias) is constant across all prop steps -> precompute here.
    w1s = jnp.concatenate([w1[:H], a1[:H]], axis=1)                   # (H, msg+att)
    w1f = jnp.concatenate([w1[H:], a1[H:]], axis=1)                   # (E+Dd, msg+att)
    b1c = jnp.concatenate([b1, ab1], axis=1)                          # (1, msg+att)
    feat = jnp.concatenate([edge_feat, dist_feat], axis=1)            # (M, E+Dd)
    feat_term = feat @ w1f + b1c                                      # (M, msg+att)

    # Fuse the second layers block-diagonally -> [msg_pre | att_logit].
    w2cat = jnp.block(
        [[w2, jnp.zeros((msg_dim, msg_dim), jnp.float32)],
         [jnp.zeros((att_hidden, msg_dim), jnp.float32), a2]])        # (msg+att, 2*msg)
    b2cat = jnp.concatenate([b2, ab2], axis=1)                        # (1, 2*msg)

    # LSTMCell weights split per gate (i,f,g,o); ih/hh biases folded together.
    b_all = bih + bhh
    wih_s = jnp.stack([wih[:, g * H:(g + 1) * H] for g in range(4)])  # (4, msg, H)
    whh_s = jnp.stack([whh[:, g * H:(g + 1) * H] for g in range(4)])  # (4, H, H)
    bg_s = jnp.stack([b_all[:, g * H:(g + 1) * H] for g in range(4)]) # (4, 1, H)
    return feat_term, w1s, w2cat, b2cat, wih_s, whh_s, bg_s, msg_dim, att_hidden


def _layer_pallas(state, state_c, src, dst, feat_term, w1s, w2cat, b2cat,
                  wih_s, whh_s, bg_s, *, num_prop, msg_dim, att_hidden,
                  apply_input_relu):
    N, H = state.shape
    M = src.shape[0]
    d1 = msg_dim + att_hidden
    flops = num_prop * 2 * (M * N * H                      # signed one-hot gather
                            + M * H * d1                   # fused first layer
                            + M * d1 * 2 * msg_dim         # fused second layer
                            + M * N * msg_dim              # scatter-add matmul
                            + 4 * (N * msg_dim * H + N * H * H))  # LSTM gates
    trans = num_prop * (M * msg_dim + 5 * N * H)           # sigmoid/tanh calls
    bytes_accessed = 4 * (4 * N * H + M * d1 + H * d1 + d1 * 2 * msg_dim
                          + 2 * msg_dim
                          + 4 * (msg_dim * H + H * H + H) + 2 * M)

    vmem = pl.BlockSpec(memory_space=pltpu.MemorySpace.VMEM)
    kernel = functools.partial(_gnn_layer_kernel, num_prop=num_prop,
                               msg_dim=msg_dim,
                               apply_input_relu=apply_input_relu)
    return pl.pallas_call(
        kernel,
        out_shape=(jax.ShapeDtypeStruct((N, H), jnp.float32),
                   jax.ShapeDtypeStruct((N, H), jnp.float32)),
        in_specs=[vmem] * 11,
        out_specs=(vmem, vmem),
        cost_estimate=pl.CostEstimate(flops=flops, transcendentals=trans,
                                      bytes_accessed=bytes_accessed),
    )(src, dst, state, state_c, feat_term, w1s, w2cat, b2cat,
      wih_s, whh_s, bg_s)


def gnn_forward(params, node_feat, node_feat_c, edge, edge_feat, dist_feat,
                num_layer=1, num_prop=1):
    """Matches GNN.forward with has_residual=False, has_graph_output=False."""
    # TODO(synk): graph_output head / residual path not exercised (defaults off).
    H = node_feat.shape[1]
    # Split src/dst in the wrapper: avoids a masked (M,2) int load and an
    # in-kernel lane slice.
    src = edge[:, 0:1].astype(jnp.int32)
    dst = edge[:, 1:2].astype(jnp.int32)
    state, state_c = node_feat, node_feat_c
    for ii in range(num_layer):
        (feat_term, w1s, w2cat, b2cat, wih_s, whh_s, bg_s,
         msg_dim, att_hidden) = _prep_layer(params[ii], edge_feat, dist_feat, H)
        state, state_c = _layer_pallas(
            state, state_c, src, dst, feat_term, w1s, w2cat, b2cat,
            wih_s, whh_s, bg_s, num_prop=num_prop, msg_dim=msg_dim,
            att_hidden=att_hidden, apply_input_relu=(ii > 0))
    return state


# ----------------------------- parameter init ------------------------------
def _lin_init(key, fan_in, fan_out):
    k1, k2 = jax.random.split(key)
    bound = 1.0 / jnp.sqrt(fan_in)
    w = jax.random.uniform(k1, (fan_in, fan_out), jnp.float32, -bound, bound)
    b = jax.random.uniform(k2, (1, fan_out), jnp.float32, -bound, bound)
    return w, b


def init_gnn_params(key, msg_dim, node_state_dim, edge_feat_dim,
                    node_dist_feat_dim, att_hidden_dim, num_layer):
    d_in = node_state_dim + edge_feat_dim + node_dist_feat_dim
    params = []
    for _ in range(num_layer):
        keys = jax.random.split(key, 8)
        key = keys[0]
        w1, b1 = _lin_init(keys[1], d_in, msg_dim)
        w2, b2 = _lin_init(keys[2], msg_dim, msg_dim)
        a1, ab1 = _lin_init(keys[3], d_in, att_hidden_dim)
        a2, ab2 = _lin_init(keys[4], att_hidden_dim, msg_dim)
        # LSTMCell: torch stores weight_ih (4H, msg_dim) / weight_hh (4H, H);
        # kept transposed here so the kernel computes x @ W.
        bound = 1.0 / jnp.sqrt(node_state_dim)
        wih = jax.random.uniform(keys[5], (msg_dim, 4 * node_state_dim),
                                 jnp.float32, -bound, bound)
        whh = jax.random.uniform(keys[6], (node_state_dim, 4 * node_state_dim),
                                 jnp.float32, -bound, bound)
        kb1, kb2 = jax.random.split(keys[7])
        bih = jax.random.uniform(kb1, (1, 4 * node_state_dim), jnp.float32,
                                 -bound, bound)
        bhh = jax.random.uniform(kb2, (1, 4 * node_state_dim), jnp.float32,
                                 -bound, bound)
        params.append((w1, b1, w2, b2, a1, ab1, a2, ab2, wih, bih, whh, bhh))
    return params


# ------------------------------ JAX reference -------------------------------
def _prop_ref(state, state_c, edge, edge_feat, dist_feat, p, emulate_bf16):
    (w1, b1, w2, b2, a1, ab1, a2, ab2, wih, bih, whh, bhh) = p
    H = state.shape[1]
    g_state = state
    if emulate_bf16:  # mirror the kernel's bf16 gather/scatter operand rounding
        g_state = state.astype(jnp.bfloat16).astype(jnp.float32)
    state_diff = g_state[edge[:, 0], :] - g_state[edge[:, 1], :]
    edge_input = jnp.concatenate([state_diff, edge_feat, dist_feat], axis=1)
    msg = jnp.maximum(edge_input @ w1 + b1, 0.0) @ w2 + b2
    att = jax.nn.sigmoid(jnp.maximum(edge_input @ a1 + ab1, 0.0) @ a2 + ab2)
    msg = msg * att
    if emulate_bf16:
        msg = msg.astype(jnp.bfloat16).astype(jnp.float32)
    state_msg = jnp.zeros((state.shape[0], msg.shape[1]), jnp.float32)
    state_msg = state_msg.at[edge[:, 1]].add(msg)
    gates = state_msg @ wih + bih + state @ whh + bhh
    i_g = jax.nn.sigmoid(gates[:, 0:H])
    f_g = jax.nn.sigmoid(gates[:, H:2 * H])
    g_g = jnp.tanh(gates[:, 2 * H:3 * H])
    o_g = jax.nn.sigmoid(gates[:, 3 * H:4 * H])
    c_new = f_g * state_c + i_g * g_g
    return o_g * jnp.tanh(c_new), c_new


def _forward_ref(params, node_feat, node_feat_c, edge, edge_feat, dist_feat,
                 num_layer, num_prop, emulate_bf16):
    state, state_c = node_feat, node_feat_c
    for ii in range(num_layer):
        if ii > 0:
            state = jnp.maximum(state, 0.0)
        for _ in range(num_prop):
            state, state_c = _prop_ref(state, state_c, edge, edge_feat,
                                       dist_feat, params[ii], emulate_bf16)
    return state


if __name__ == "__main__":
    # small config consistent with the module's __init__
    msg_dim = 32
    node_state_dim = 32
    edge_feat_dim = 8
    node_dist_feat_dim = 16
    att_hidden_dim = 32
    num_layer = 2
    num_prop = 2

    N, M = 16, 24  # nodes, edges

    key = jax.random.PRNGKey(0)
    kp, kn, kc, ke, kef, kdf = jax.random.split(key, 6)

    params = init_gnn_params(kp, msg_dim, node_state_dim, edge_feat_dim,
                             node_dist_feat_dim, att_hidden_dim, num_layer)

    node_feat = jax.random.normal(kn, (N, node_state_dim), jnp.float32)
    node_feat_c = jax.random.normal(kc, (N, node_state_dim), jnp.float32)
    edge = jax.random.randint(ke, (M, 2), 0, N, jnp.int32)
    edge_feat = jax.random.normal(kef, (M, edge_feat_dim), jnp.float32)
    dist_feat = jax.random.normal(kdf, (M, node_dist_feat_dim), jnp.float32)

    out = gnn_forward(params, node_feat, node_feat_c, edge, edge_feat,
                      dist_feat, num_layer=num_layer, num_prop=num_prop)
    out = jax.block_until_ready(out)

    # tight check: reference that applies the same bf16 rounding the kernel
    # uses on the gather/scatter operands (everything else f32)
    ref_bf = _forward_ref(params, node_feat, node_feat_c, edge, edge_feat,
                          dist_feat, num_layer, num_prop, emulate_bf16=True)
    assert jnp.allclose(out, ref_bf, atol=2e-3, rtol=2e-3), \
        "mismatch vs bf16-emulating reference"

    # sanity band vs the exact f32 reference (bounds the bf16 rounding impact)
    ref_f32 = _forward_ref(params, node_feat, node_feat_c, edge, edge_feat,
                           dist_feat, num_layer, num_prop, emulate_bf16=False)
    assert jnp.allclose(out, ref_f32, atol=3e-2, rtol=3e-2), \
        "mismatch vs exact f32 reference"

    print("KERNEL_OK")
</pallas_src>

<mosaic_0001>
module attributes {stable_mosaic.version = 11 : i64} {
  func.func @_gnn_layer_kernel(%arg0: memref<24x1xi32, #tpu.memory_space<vmem>>, %arg1: memref<24x1xi32, #tpu.memory_space<vmem>>, %arg2: memref<16x32xf32, #tpu.memory_space<vmem>>, %arg3: memref<16x32xf32, #tpu.memory_space<vmem>>, %arg4: memref<24x64xf32, #tpu.memory_space<vmem>>, %arg5: memref<32x64xf32, #tpu.memory_space<vmem>>, %arg6: memref<64x64xf32, #tpu.memory_space<vmem>>, %arg7: memref<1x64xf32, #tpu.memory_space<vmem>>, %arg8: memref<4x32x32xf32, #tpu.memory_space<vmem>>, %arg9: memref<4x32x32xf32, #tpu.memory_space<vmem>>, %arg10: memref<4x1x32xf32, #tpu.memory_space<vmem>>, %arg11: memref<16x32xf32, #tpu.memory_space<vmem>>, %arg12: memref<16x32xf32, #tpu.memory_space<vmem>>) attributes {dimension_semantics = [], scalar_prefetch = 0 : i64, scratch_operands = 0 : i64, tpu.core_type = #tpu.core_type<tc>} {
    %0 = tpu.iota {dimensions = array<i32: 1>} : vector<24x16xi32>
    %c0 = arith.constant 0 : index
    %c0_0 = arith.constant 0 : index
    %1 = vector.load %arg1[%c0, %c0_0] : memref<24x1xi32, #tpu.memory_space<vmem>>, vector<24x1xi32>
    %2 = vector.broadcast %1 : vector<24x1xi32> to vector<24x16xi32>
    %3 = arith.cmpi eq, %0, %2 : vector<24x16xi32>
    %4 = arith.extui %3 : vector<24x16xi1> to vector<24x16xi32>
    %5 = arith.sitofp %4 : vector<24x16xi32> to vector<24x16xf32>
    %c0_1 = arith.constant 0 : index
    %c0_2 = arith.constant 0 : index
    %6 = vector.load %arg0[%c0_1, %c0_2] : memref<24x1xi32, #tpu.memory_space<vmem>>, vector<24x1xi32>
    %7 = vector.broadcast %6 : vector<24x1xi32> to vector<24x16xi32>
    %8 = arith.cmpi eq, %0, %7 : vector<24x16xi32>
    %9 = arith.extui %8 : vector<24x16xi1> to vector<24x16xi32>
    %10 = arith.sitofp %9 : vector<24x16xi32> to vector<24x16xf32>
    %11 = arith.subf %10, %5 : vector<24x16xf32>
    %12 = arith.truncf %11 : vector<24x16xf32> to vector<24x16xbf16>
    %13 = arith.truncf %5 : vector<24x16xf32> to vector<24x16xbf16>
    %c0_3 = arith.constant 0 : index
    %c0_4 = arith.constant 0 : index
    %14 = vector.load %arg2[%c0_3, %c0_4] : memref<16x32xf32, #tpu.memory_space<vmem>>, vector<16x32xf32>
    %c0_5 = arith.constant 0 : index
    %c0_6 = arith.constant 0 : index
    %15 = vector.load %arg3[%c0_5, %c0_6] : memref<16x32xf32, #tpu.memory_space<vmem>>, vector<16x32xf32>
    %c0_7 = arith.constant 0 : index
    %c0_8 = arith.constant 0 : index
    %16 = vector.load %arg4[%c0_7, %c0_8] : memref<24x64xf32, #tpu.memory_space<vmem>>, vector<24x64xf32>
    %c0_9 = arith.constant 0 : index
    %c0_10 = arith.constant 0 : index
    %17 = vector.load %arg5[%c0_9, %c0_10] : memref<32x64xf32, #tpu.memory_space<vmem>>, vector<32x64xf32>
    %c0_11 = arith.constant 0 : index
    %c0_12 = arith.constant 0 : index
    %18 = vector.load %arg6[%c0_11, %c0_12] : memref<64x64xf32, #tpu.memory_space<vmem>>, vector<64x64xf32>
    %c0_13 = arith.constant 0 : index
    %c0_14 = arith.constant 0 : index
    %19 = vector.load %arg7[%c0_13, %c0_14] : memref<1x64xf32, #tpu.memory_space<vmem>>, vector<1x64xf32>
    %20 = arith.truncf %14 : vector<16x32xf32> to vector<16x32xbf16>
    %cst = arith.constant dense<0.000000e+00> : vector<24x32xf32>
    %21 = tpu.matmul %12, %20, %cst {dimension_numbers = #tpu.dot_dimension_numbers<[1], [0], [0], [1], [0, 0, 1, 1], [], []>} : vector<24x16xbf16>, vector<16x32xbf16>, vector<24x32xf32> -> vector<24x32xf32>
    %cst_15 = arith.constant dense<0.000000e+00> : vector<24x64xf32>
    %22 = tpu.matmul %21, %17, %cst_15 {dimension_numbers = #tpu.dot_dimension_numbers<[1], [0], [0], [1], [0, 0, 1, 1], [], []>} : vector<24x32xf32>, vector<32x64xf32>, vector<24x64xf32> -> vector<24x64xf32>
    %23 = arith.addf %22, %16 : vector<24x64xf32>
    %cst_16 = arith.constant 0.000000e+00 : f32
    %24 = vector.broadcast %cst_16 : f32 to vector<24x64xf32>
    %25 = arith.maximumf %23, %24 : vector<24x64xf32>
    %cst_17 = arith.constant dense<0.000000e+00> : vector<24x64xf32>
    %26 = tpu.matmul %25, %18, %cst_17 {dimension_numbers = #tpu.dot_dimension_numbers<[1], [0], [0], [1], [0, 0, 1, 1], [], []>} : vector<24x64xf32>, vector<64x64xf32>, vector<24x64xf32> -> vector<24x64xf32>
    %27 = vector.broadcast %19 : vector<1x64xf32> to vector<24x64xf32>
    %28 = arith.addf %26, %27 : vector<24x64xf32>
    %29 = vector.extract_strided_slice %28 {offsets = [0, 0], sizes = [24, 32], strides = [1, 1]} : vector<24x64xf32> to vector<24x32xf32>
    %30 = vector.extract_strided_slice %28 {offsets = [0, 32], sizes = [24, 32], strides = [1, 1]} : vector<24x64xf32> to vector<24x32xf32>
    %31 = arith.negf %30 : vector<24x32xf32>
    %32 = math.exp %31 : vector<24x32xf32>
    %cst_18 = arith.constant 1.000000e+00 : f32
    %33 = vector.broadcast %cst_18 : f32 to vector<24x32xf32>
    %34 = arith.addf %33, %32 : vector<24x32xf32>
    %35 = arith.divf %33, %34 : vector<24x32xf32>
    %36 = arith.mulf %29, %35 : vector<24x32xf32>
    %37 = arith.truncf %36 : vector<24x32xf32> to vector<24x32xbf16>
    %cst_19 = arith.constant dense<0.000000e+00> : vector<16x32xf32>
    %38 = tpu.matmul %13, %37, %cst_19 {dimension_numbers = #tpu.dot_dimension_numbers<[0], [0], [1], [1], [0, 1, 1, 1], [], []>} : vector<24x16xbf16>, vector<24x32xbf16>, vector<16x32xf32> -> vector<16x32xf32>
    %c0_20 = arith.constant 0 : index
    %c0_21 = arith.constant 0 : index
    %c0_22 = arith.constant 0 : index
    %39 = vector.load %arg8[%c0_20, %c0_21, %c0_22] : memref<4x32x32xf32, #tpu.memory_space<vmem>>, vector<1x32x32xf32>
    %40 = vector.shape_cast %39 : vector<1x32x32xf32> to vector<32x32xf32>
    %cst_23 = arith.constant dense<0.000000e+00> : vector<16x32xf32>
    %41 = tpu.matmul %38, %40, %cst_23 {dimension_numbers = #tpu.dot_dimension_numbers<[1], [0], [0], [1], [0, 0, 1, 1], [], []>} : vector<16x32xf32>, vector<32x32xf32>, vector<16x32xf32> -> vector<16x32xf32>
    %c0_24 = arith.constant 0 : index
    %c0_25 = arith.constant 0 : index
    %c0_26 = arith.constant 0 : index
    %42 = vector.load %arg9[%c0_24, %c0_25, %c0_26] : memref<4x32x32xf32, #tpu.memory_space<vmem>>, vector<1x32x32xf32>
    %43 = vector.shape_cast %42 : vector<1x32x32xf32> to vector<32x32xf32>
    %cst_27 = arith.constant dense<0.000000e+00> : vector<16x32xf32>
    %44 = tpu.matmul %14, %43, %cst_27 {dimension_numbers = #tpu.dot_dimension_numbers<[1], [0], [0], [1], [0, 0, 1, 1], [], []>} : vector<16x32xf32>, vector<32x32xf32>, vector<16x32xf32> -> vector<16x32xf32>
    %45 = arith.addf %41, %44 : vector<16x32xf32>
    %c0_28 = arith.constant 0 : index
    %c0_29 = arith.constant 0 : index
    %c0_30 = arith.constant 0 : index
    %46 = vector.load %arg10[%c0_28, %c0_29, %c0_30] : memref<4x1x32xf32, #tpu.memory_space<vmem>>, vector<1x1x32xf32>
    %47 = vector.shape_cast %46 : vector<1x1x32xf32> to vector<1x32xf32>
    %48 = vector.broadcast %47 : vector<1x32xf32> to vector<16x32xf32>
    %49 = arith.addf %45, %48 : vector<16x32xf32>
    %c1 = arith.constant 1 : index
    %c0_31 = arith.constant 0 : index
    %c0_32 = arith.constant 0 : index
    %50 = vector.load %arg8[%c1, %c0_31, %c0_32] : memref<4x32x32xf32, #tpu.memory_space<vmem>>, vector<1x32x32xf32>
    %51 = vector.shape_cast %50 : vector<1x32x32xf32> to vector<32x32xf32>
    %cst_33 = arith.constant dense<0.000000e+00> : vector<16x32xf32>
    %52 = tpu.matmul %38, %51, %cst_33 {dimension_numbers = #tpu.dot_dimension_numbers<[1], [0], [0], [1], [0, 0, 1, 1], [], []>} : vector<16x32xf32>, vector<32x32xf32>, vector<16x32xf32> -> vector<16x32xf32>
    %c1_34 = arith.constant 1 : index
    %c0_35 = arith.constant 0 : index
    %c0_36 = arith.constant 0 : index
    %53 = vector.load %arg9[%c1_34, %c0_35, %c0_36] : memref<4x32x32xf32, #tpu.memory_space<vmem>>, vector<1x32x32xf32>
    %54 = vector.shape_cast %53 : vector<1x32x32xf32> to vector<32x32xf32>
    %cst_37 = arith.constant dense<0.000000e+00> : vector<16x32xf32>
    %55 = tpu.matmul %14, %54, %cst_37 {dimension_numbers = #tpu.dot_dimension_numbers<[1], [0], [0], [1], [0, 0, 1, 1], [], []>} : vector<16x32xf32>, vector<32x32xf32>, vector<16x32xf32> -> vector<16x32xf32>
    %56 = arith.addf %52, %55 : vector<16x32xf32>
    %c1_38 = arith.constant 1 : index
    %c0_39 = arith.constant 0 : index
    %c0_40 = arith.constant 0 : index
    %57 = vector.load %arg10[%c1_38, %c0_39, %c0_40] : memref<4x1x32xf32, #tpu.memory_space<vmem>>, vector<1x1x32xf32>
    %58 = vector.shape_cast %57 : vector<1x1x32xf32> to vector<1x32xf32>
    %59 = vector.broadcast %58 : vector<1x32xf32> to vector<16x32xf32>
    %60 = arith.addf %56, %59 : vector<16x32xf32>
    %c2 = arith.constant 2 : index
    %c0_41 = arith.constant 0 : index
    %c0_42 = arith.constant 0 : index
    %61 = vector.load %arg8[%c2, %c0_41, %c0_42] : memref<4x32x32xf32, #tpu.memory_space<vmem>>, vector<1x32x32xf32>
    %62 = vector.shape_cast %61 : vector<1x32x32xf32> to vector<32x32xf32>
    %cst_43 = arith.constant dense<0.000000e+00> : vector<16x32xf32>
    %63 = tpu.matmul %38, %62, %cst_43 {dimension_numbers = #tpu.dot_dimension_numbers<[1], [0], [0], [1], [0, 0, 1, 1], [], []>} : vector<16x32xf32>, vector<32x32xf32>, vector<16x32xf32> -> vector<16x32xf32>
    %c2_44 = arith.constant 2 : index
    %c0_45 = arith.constant 0 : index
    %c0_46 = arith.constant 0 : index
    %64 = vector.load %arg9[%c2_44, %c0_45, %c0_46] : memref<4x32x32xf32, #tpu.memory_space<vmem>>, vector<1x32x32xf32>
    %65 = vector.shape_cast %64 : vector<1x32x32xf32> to vector<32x32xf32>
    %cst_47 = arith.constant dense<0.000000e+00> : vector<16x32xf32>
    %66 = tpu.matmul %14, %65, %cst_47 {dimension_numbers = #tpu.dot_dimension_numbers<[1], [0], [0], [1], [0, 0, 1, 1], [], []>} : vector<16x32xf32>, vector<32x32xf32>, vector<16x32xf32> -> vector<16x32xf32>
    %67 = arith.addf %63, %66 : vector<16x32xf32>
    %c2_48 = arith.constant 2 : index
    %c0_49 = arith.constant 0 : index
    %c0_50 = arith.constant 0 : index
    %68 = vector.load %arg10[%c2_48, %c0_49, %c0_50] : memref<4x1x32xf32, #tpu.memory_space<vmem>>, vector<1x1x32xf32>
    %69 = vector.shape_cast %68 : vector<1x1x32xf32> to vector<1x32xf32>
    %70 = vector.broadcast %69 : vector<1x32xf32> to vector<16x32xf32>
    %71 = arith.addf %67, %70 : vector<16x32xf32>
    %c3 = arith.constant 3 : index
    %c0_51 = arith.constant 0 : index
    %c0_52 = arith.constant 0 : index
    %72 = vector.load %arg8[%c3, %c0_51, %c0_52] : memref<4x32x32xf32, #tpu.memory_space<vmem>>, vector<1x32x32xf32>
    %73 = vector.shape_cast %72 : vector<1x32x32xf32> to vector<32x32xf32>
    %cst_53 = arith.constant dense<0.000000e+00> : vector<16x32xf32>
    %74 = tpu.matmul %38, %73, %cst_53 {dimension_numbers = #tpu.dot_dimension_numbers<[1], [0], [0], [1], [0, 0, 1, 1], [], []>} : vector<16x32xf32>, vector<32x32xf32>, vector<16x32xf32> -> vector<16x32xf32>
    %c3_54 = arith.constant 3 : index
    %c0_55 = arith.constant 0 : index
    %c0_56 = arith.constant 0 : index
    %75 = vector.load %arg9[%c3_54, %c0_55, %c0_56] : memref<4x32x32xf32, #tpu.memory_space<vmem>>, vector<1x32x32xf32>
    %76 = vector.shape_cast %75 : vector<1x32x32xf32> to vector<32x32xf32>
    %cst_57 = arith.constant dense<0.000000e+00> : vector<16x32xf32>
    %77 = tpu.matmul %14, %76, %cst_57 {dimension_numbers = #tpu.dot_dimension_numbers<[1], [0], [0], [1], [0, 0, 1, 1], [], []>} : vector<16x32xf32>, vector<32x32xf32>, vector<16x32xf32> -> vector<16x32xf32>
    %78 = arith.addf %74, %77 : vector<16x32xf32>
    %c3_58 = arith.constant 3 : index
    %c0_59 = arith.constant 0 : index
    %c0_60 = arith.constant 0 : index
    %79 = vector.load %arg10[%c3_58, %c0_59, %c0_60] : memref<4x1x32xf32, #tpu.memory_space<vmem>>, vector<1x1x32xf32>
    %80 = vector.shape_cast %79 : vector<1x1x32xf32> to vector<1x32xf32>
    %81 = vector.broadcast %80 : vector<1x32xf32> to vector<16x32xf32>
    %82 = arith.addf %78, %81 : vector<16x32xf32>
    %83 = arith.negf %49 : vector<16x32xf32>
    %84 = math.exp %83 : vector<16x32xf32>
    %cst_61 = arith.constant 1.000000e+00 : f32
    %85 = vector.broadcast %cst_61 : f32 to vector<16x32xf32>
    %86 = arith.addf %85, %84 : vector<16x32xf32>
    %87 = arith.divf %85, %86 : vector<16x32xf32>
    %88 = arith.negf %60 : vector<16x32xf32>
    %89 = math.exp %88 : vector<16x32xf32>
    %cst_62 = arith.constant 1.000000e+00 : f32
    %90 = vector.broadcast %cst_62 : f32 to vector<16x32xf32>
    %91 = arith.addf %90, %89 : vector<16x32xf32>
    %92 = arith.divf %90, %91 : vector<16x32xf32>
    %93 = math.tanh %71 : vector<16x32xf32>
    %94 = arith.negf %82 : vector<16x32xf32>
    %95 = math.exp %94 : vector<16x32xf32>
    %cst_63 = arith.constant 1.000000e+00 : f32
    %96 = vector.broadcast %cst_63 : f32 to vector<16x32xf32>
    %97 = arith.addf %96, %95 : vector<16x32xf32>
    %98 = arith.divf %96, %97 : vector<16x32xf32>
    %99 = arith.mulf %92, %15 : vector<16x32xf32>
    %100 = arith.mulf %87, %93 : vector<16x32xf32>
    %101 = arith.addf %99, %100 : vector<16x32xf32>
    %102 = math.tanh %101 : vector<16x32xf32>
    %103 = arith.mulf %98, %102 : vector<16x32xf32>
    %104 = arith.truncf %103 : vector<16x32xf32> to vector<16x32xbf16>
    %cst_64 = arith.constant dense<0.000000e+00> : vector<24x32xf32>
    %105 = tpu.matmul %12, %104, %cst_64 {dimension_numbers = #tpu.dot_dimension_numbers<[1], [0], [0], [1], [0, 0, 1, 1], [], []>} : vector<24x16xbf16>, vector<16x32xbf16>, vector<24x32xf32> -> vector<24x32xf32>
    %cst_65 = arith.constant dense<0.000000e+00> : vector<24x64xf32>
    %106 = tpu.matmul %105, %17, %cst_65 {dimension_numbers = #tpu.dot_dimension_numbers<[1], [0], [0], [1], [0, 0, 1, 1], [], []>} : vector<24x32xf32>, vector<32x64xf32>, vector<24x64xf32> -> vector<24x64xf32>
    %107 = arith.addf %106, %16 : vector<24x64xf32>
    %cst_66 = arith.constant 0.000000e+00 : f32
    %108 = vector.broadcast %cst_66 : f32 to vector<24x64xf32>
    %109 = arith.maximumf %107, %108 : vector<24x64xf32>
    %cst_67 = arith.constant dense<0.000000e+00> : vector<24x64xf32>
    %110 = tpu.matmul %109, %18, %cst_67 {dimension_numbers = #tpu.dot_dimension_numbers<[1], [0], [0], [1], [0, 0, 1, 1], [], []>} : vector<24x64xf32>, vector<64x64xf32>, vector<24x64xf32> -> vector<24x64xf32>
    %111 = vector.broadcast %19 : vector<1x64xf32> to vector<24x64xf32>
    %112 = arith.addf %110, %111 : vector<24x64xf32>
    %113 = vector.extract_strided_slice %112 {offsets = [0, 0], sizes = [24, 32], strides = [1, 1]} : vector<24x64xf32> to vector<24x32xf32>
    %114 = vector.extract_strided_slice %112 {offsets = [0, 32], sizes = [24, 32], strides = [1, 1]} : vector<24x64xf32> to vector<24x32xf32>
    %115 = arith.negf %114 : vector<24x32xf32>
    %116 = math.exp %115 : vector<24x32xf32>
    %cst_68 = arith.constant 1.000000e+00 : f32
    %117 = vector.broadcast %cst_68 : f32 to vector<24x32xf32>
    %118 = arith.addf %117, %116 : vector<24x32xf32>
    %119 = arith.divf %117, %118 : vector<24x32xf32>
    %120 = arith.mulf %113, %119 : vector<24x32xf32>
    %121 = arith.truncf %120 : vector<24x32xf32> to vector<24x32xbf16>
    %cst_69 = arith.constant dense<0.000000e+00> : vector<16x32xf32>
    %122 = tpu.matmul %13, %121, %cst_69 {dimension_numbers = #tpu.dot_dimension_numbers<[0], [0], [1], [1], [0, 1, 1, 1], [], []>} : vector<24x16xbf16>, vector<24x32xbf16>, vector<16x32xf32> -> vector<16x32xf32>
    %c0_70 = arith.constant 0 : index
    %c0_71 = arith.constant 0 : index
    %c0_72 = arith.constant 0 : index
    %123 = vector.load %arg8[%c0_70, %c0_71, %c0_72] : memref<4x32x32xf32, #tpu.memory_space<vmem>>, vector<1x32x32xf32>
    %124 = vector.shape_cast %123 : vector<1x32x32xf32> to vector<32x32xf32>
    %cst_73 = arith.constant dense<0.000000e+00> : vector<16x32xf32>
    %125 = tpu.matmul %122, %124, %cst_73 {dimension_numbers = #tpu.dot_dimension_numbers<[1], [0], [0], [1], [0, 0, 1, 1], [], []>} : vector<16x32xf32>, vector<32x32xf32>, vector<16x32xf32> -> vector<16x32xf32>
    %c0_74 = arith.constant 0 : index
    %c0_75 = arith.constant 0 : index
    %c0_76 = arith.constant 0 : index
    %126 = vector.load %arg9[%c0_74, %c0_75, %c0_76] : memref<4x32x32xf32, #tpu.memory_space<vmem>>, vector<1x32x32xf32>
    %127 = vector.shape_cast %126 : vector<1x32x32xf32> to vector<32x32xf32>
    %cst_77 = arith.constant dense<0.000000e+00> : vector<16x32xf32>
    %128 = tpu.matmul %103, %127, %cst_77 {dimension_numbers = #tpu.dot_dimension_numbers<[1], [0], [0], [1], [0, 0, 1, 1], [], []>} : vector<16x32xf32>, vector<32x32xf32>, vector<16x32xf32> -> vector<16x32xf32>
    %129 = arith.addf %125, %128 : vector<16x32xf32>
    %c0_78 = arith.constant 0 : index
    %c0_79 = arith.constant 0 : index
    %c0_80 = arith.constant 0 : index
    %130 = vector.load %arg10[%c0_78, %c0_79, %c0_80] : memref<4x1x32xf32, #tpu.memory_space<vmem>>, vector<1x1x32xf32>
    %131 = vector.shape_cast %130 : vector<1x1x32xf32> to vector<1x32xf32>
    %132 = vector.broadcast %131 : vector<1x32xf32> to vector<16x32xf32>
    %133 = arith.addf %129, %132 : vector<16x32xf32>
    %c1_81 = arith.constant 1 : index
    %c0_82 = arith.constant 0 : index
    %c0_83 = arith.constant 0 : index
    %134 = vector.load %arg8[%c1_81, %c0_82, %c0_83] : memref<4x32x32xf32, #tpu.memory_space<vmem>>, vector<1x32x32xf32>
    %135 = vector.shape_cast %134 : vector<1x32x32xf32> to vector<32x32xf32>
    %cst_84 = arith.constant dense<0.000000e+00> : vector<16x32xf32>
    %136 = tpu.matmul %122, %135, %cst_84 {dimension_numbers = #tpu.dot_dimension_numbers<[1], [0], [0], [1], [0, 0, 1, 1], [], []>} : vector<16x32xf32>, vector<32x32xf32>, vector<16x32xf32> -> vector<16x32xf32>
    %c1_85 = arith.constant 1 : index
    %c0_86 = arith.constant 0 : index
    %c0_87 = arith.constant 0 : index
    %137 = vector.load %arg9[%c1_85, %c0_86, %c0_87] : memref<4x32x32xf32, #tpu.memory_space<vmem>>, vector<1x32x32xf32>
    %138 = vector.shape_cast %137 : vector<1x32x32xf32> to vector<32x32xf32>
    %cst_88 = arith.constant dense<0.000000e+00> : vector<16x32xf32>
    %139 = tpu.matmul %103, %138, %cst_88 {dimension_numbers = #tpu.dot_dimension_numbers<[1], [0], [0], [1], [0, 0, 1, 1], [], []>} : vector<16x32xf32>, vector<32x32xf32>, vector<16x32xf32> -> vector<16x32xf32>
    %140 = arith.addf %136, %139 : vector<16x32xf32>
    %c1_89 = arith.constant 1 : index
    %c0_90 = arith.constant 0 : index
    %c0_91 = arith.constant 0 : index
    %141 = vector.load %arg10[%c1_89, %c0_90, %c0_91] : memref<4x1x32xf32, #tpu.memory_space<vmem>>, vector<1x1x32xf32>
    %142 = vector.shape_cast %141 : vector<1x1x32xf32> to vector<1x32xf32>
    %143 = vector.broadcast %142 : vector<1x32xf32> to vector<16x32xf32>
    %144 = arith.addf %140, %143 : vector<16x32xf32>
    %c2_92 = arith.constant 2 : index
    %c0_93 = arith.constant 0 : index
    %c0_94 = arith.constant 0 : index
    %145 = vector.load %arg8[%c2_92, %c0_93, %c0_94] : memref<4x32x32xf32, #tpu.memory_space<vmem>>, vector<1x32x32xf32>
    %146 = vector.shape_cast %145 : vector<1x32x32xf32> to vector<32x32xf32>
    %cst_95 = arith.constant dense<0.000000e+00> : vector<16x32xf32>
    %147 = tpu.matmul %122, %146, %cst_95 {dimension_numbers = #tpu.dot_dimension_numbers<[1], [0], [0], [1], [0, 0, 1, 1], [], []>} : vector<16x32xf32>, vector<32x32xf32>, vector<16x32xf32> -> vector<16x32xf32>
    %c2_96 = arith.constant 2 : index
    %c0_97 = arith.constant 0 : index
    %c0_98 = arith.constant 0 : index
    %148 = vector.load %arg9[%c2_96, %c0_97, %c0_98] : memref<4x32x32xf32, #tpu.memory_space<vmem>>, vector<1x32x32xf32>
    %149 = vector.shape_cast %148 : vector<1x32x32xf32> to vector<32x32xf32>
    %cst_99 = arith.constant dense<0.000000e+00> : vector<16x32xf32>
    %150 = tpu.matmul %103, %149, %cst_99 {dimension_numbers = #tpu.dot_dimension_numbers<[1], [0], [0], [1], [0, 0, 1, 1], [], []>} : vector<16x32xf32>, vector<32x32xf32>, vector<16x32xf32> -> vector<16x32xf32>
    %151 = arith.addf %147, %150 : vector<16x32xf32>
    %c2_100 = arith.constant 2 : index
    %c0_101 = arith.constant 0 : index
    %c0_102 = arith.constant 0 : index
    %152 = vector.load %arg10[%c2_100, %c0_101, %c0_102] : memref<4x1x32xf32, #tpu.memory_space<vmem>>, vector<1x1x32xf32>
    %153 = vector.shape_cast %152 : vector<1x1x32xf32> to vector<1x32xf32>
    %154 = vector.broadcast %153 : vector<1x32xf32> to vector<16x32xf32>
    %155 = arith.addf %151, %154 : vector<16x32xf32>
    %c3_103 = arith.constant 3 : index
    %c0_104 = arith.constant 0 : index
    %c0_105 = arith.constant 0 : index
    %156 = vector.load %arg8[%c3_103, %c0_104, %c0_105] : memref<4x32x32xf32, #tpu.memory_space<vmem>>, vector<1x32x32xf32>
    %157 = vector.shape_cast %156 : vector<1x32x32xf32> to vector<32x32xf32>
    %cst_106 = arith.constant dense<0.000000e+00> : vector<16x32xf32>
    %158 = tpu.matmul %122, %157, %cst_106 {dimension_numbers = #tpu.dot_dimension_numbers<[1], [0], [0], [1], [0, 0, 1, 1], [], []>} : vector<16x32xf32>, vector<32x32xf32>, vector<16x32xf32> -> vector<16x32xf32>
    %c3_107 = arith.constant 3 : index
    %c0_108 = arith.constant 0 : index
    %c0_109 = arith.constant 0 : index
    %159 = vector.load %arg9[%c3_107, %c0_108, %c0_109] : memref<4x32x32xf32, #tpu.memory_space<vmem>>, vector<1x32x32xf32>
    %160 = vector.shape_cast %159 : vector<1x32x32xf32> to vector<32x32xf32>
    %cst_110 = arith.constant dense<0.000000e+00> : vector<16x32xf32>
    %161 = tpu.matmul %103, %160, %cst_110 {dimension_numbers = #tpu.dot_dimension_numbers<[1], [0], [0], [1], [0, 0, 1, 1], [], []>} : vector<16x32xf32>, vector<32x32xf32>, vector<16x32xf32> -> vector<16x32xf32>
    %162 = arith.addf %158, %161 : vector<16x32xf32>
    %c3_111 = arith.constant 3 : index
    %c0_112 = arith.constant 0 : index
    %c0_113 = arith.constant 0 : index
    %163 = vector.load %arg10[%c3_111, %c0_112, %c0_113] : memref<4x1x32xf32, #tpu.memory_space<vmem>>, vector<1x1x32xf32>
    %164 = vector.shape_cast %163 : vector<1x1x32xf32> to vector<1x32xf32>
    %165 = vector.broadcast %164 : vector<1x32xf32> to vector<16x32xf32>
    %166 = arith.addf %162, %165 : vector<16x32xf32>
    %167 = arith.negf %133 : vector<16x32xf32>
    %168 = math.exp %167 : vector<16x32xf32>
    %cst_114 = arith.constant 1.000000e+00 : f32
    %169 = vector.broadcast %cst_114 : f32 to vector<16x32xf32>
    %170 = arith.addf %169, %168 : vector<16x32xf32>
    %171 = arith.divf %169, %170 : vector<16x32xf32>
    %172 = arith.negf %144 : vector<16x32xf32>
    %173 = math.exp %172 : vector<16x32xf32>
    %cst_115 = arith.constant 1.000000e+00 : f32
    %174 = vector.broadcast %cst_115 : f32 to vector<16x32xf32>
    %175 = arith.addf %174, %173 : vector<16x32xf32>
    %176 = arith.divf %174, %175 : vector<16x32xf32>
    %177 = math.tanh %155 : vector<16x32xf32>
    %178 = arith.negf %166 : vector<16x32xf32>
    %179 = math.exp %178 : vector<16x32xf32>
    %cst_116 = arith.constant 1.000000e+00 : f32
    %180 = vector.broadcast %cst_116 : f32 to vector<16x32xf32>
    %181 = arith.addf %180, %179 : vector<16x32xf32>
    %182 = arith.divf %180, %181 : vector<16x32xf32>
    %183 = arith.mulf %176, %101 : vector<16x32xf32>
    %184 = arith.mulf %171, %177 : vector<16x32xf32>
    %185 = arith.addf %183, %184 : vector<16x32xf32>
    %186 = math.tanh %185 : vector<16x32xf32>
    %187 = arith.mulf %182, %186 : vector<16x32xf32>
    %c0_117 = arith.constant 0 : index
    %c0_118 = arith.constant 0 : index
    %188 = vector.load %arg11[%c0_117, %c0_118] : memref<16x32xf32, #tpu.memory_space<vmem>>, vector<16x32xf32>
    tpu.vector_store %arg11[%c0_117, %c0_118], %187 {strides = array<i32>} : memref<16x32xf32, #tpu.memory_space<vmem>>, vector<16x32xf32>,
    %c0_119 = arith.constant 0 : index
    %c0_120 = arith.constant 0 : index
    %189 = vector.load %arg12[%c0_119, %c0_120] : memref<16x32xf32, #tpu.memory_space<vmem>>, vector<16x32xf32>
    tpu.vector_store %arg12[%c0_119, %c0_120], %185 {strides = array<i32>} : memref<16x32xf32, #tpu.memory_space<vmem>>, vector<16x32xf32>,
    return
  }
}

</mosaic_0001>

<bundles_post_ra>
// kernel: tpu_custom_call.1
= control target key start
LH: loop header
LB: loop body
LE: loop exit
PB: predicated region body
PF: predicated region fallthrough
CT: control target
= control target key end

     0   :  { %18 = vsyncpa [#allocation3], 0  ;;  %s3900_s0 = inlined_call_operand.vmem [shape: s32[24,1], index: 0, kind: input, shape index: {}]   ;;  %s3901_s1 = inlined_call_operand.vmem [shape: s32[24,1], index: 1, kind: input, shape index: {}]   ;;  %s3902_s2 = inlined_call_operand.hbm [shape: f32[16,32], index: 2, kind: input, shape index: {}]   ;;  %s3903_s3 = inlined_call_operand.hbm [shape: f32[16,32], index: 3, kind: input, shape index: {}]   ;;  %s3904_s4 = inlined_call_operand.hbm [shape: f32[24,64], index: 4, kind: input, shape index: {}]   ;;  %s3905_s5 = inlined_call_operand.hbm [shape: f32[32,64], index: 5, kind: input, shape index: {}]   ;;  %s3906_s6 = inlined_call_operand.vmem [shape: f32[64,64], index: 6, kind: input, shape index: {}]   ;;  %s3907_s7 = inlined_call_operand.vmem [shape: f32[1,64], index: 7, kind: input, shape index: {}]   ;;  %s3908_s8 = inlined_call_operand.hbm [shape: f32[4,32,32], index: 8, kind: input, shape index: {}]   ;;  %s3909_s9 = inlined_call_operand.hbm [shape: f32[4,32,32], index: 9, kind: input, shape index: {}]   ;;  %s3910_s10 = inlined_call_operand.vmem [shape: f32[4,1,32], index: 10, kind: input, shape index: {}]   ;;  %s3911_s11 = inlined_call_operand.hbm [shape: f32[16,32], index: 11, kind: output, shape index: {0}]   ;;  %s3912_s12 = inlined_call_operand.hbm [shape: f32[16,32], index: 12, kind: output, shape index: {1}]  }
   0x1   :  { %19 = vsyncpa [#allocation6], 0 }
   0x2   :  { %20 = vsyncpa [#allocation9], 0 }
   0x3   :  { %21 = vsyncpa [#allocation12], 0 }
   0x4   :  { %22 = vsyncpa [#allocation4], 0 }
   0x5   :  { %23 = vsyncpa [#allocation15], 0  ;;  %s3282_s21 = smov [#allocation5]   ;;  %s3283_s23 = smov [#allocation8]  }
   0x6   :  { %s45_s22 = sshll.u32 %s3282_s21, 4  ;;  %s69_s24 = sshll.u32 %s3283_s23, 4  ;;  %s46_s22 = int_to_ptr.vmem [resolvable:$true] %s45_s22  ;;  %s3362_s24 = int_to_ptr.vmem [resolvable:$true] %s69_s24 }
   0x7   :  { %s3094_s27 = scalar_lea.hbm %s3903_s3, 256 }
   0x8   :  { %p3095_p0 = scmp.ne.s32.totalorder %s3903_s3, %s3094_s27  ;;  %p3098_p1 = scmp.lt.u32.totalorder %s3094_s27, %s3903_s3 }
   0xa   :  { %p3100_p2 = pnand %p3098_p1, %p3095_p0 }
   0xc   :  { %3103 = shalt.err (!%p3100_p2)
}
   0xd   :  { %s3104_s14 = scalar_lea.vmem %s46_s22, 256  ;;  %p3109_p4 = scmp.lt.s32.totalorder %s46_s22, %s46_s22 }
   0xe   :  { %p3105_p3 = scmp.ne.s32.totalorder %s46_s22, %s3104_s14  ;;  %p3110_p5 = scmp.lt.s32.totalorder %s3104_s14, %s3104_s14 }
  0x10   :  { %p3111_p6 = por %p3110_p5, %p3109_p4 }
  0x12   :  { %p3112_p7 = pnand %p3111_p6, %p3105_p3 }
  0x14   :  { %3115 = shalt.err (!%p3112_p7)
}
  0x15   :  { %s3284_s15 = smov 128   ;;  %s3285_s16 = smov 8  }
  0x16   :  { %51 = dma.hbm_to_vmem [thread:$0]  %s3903_s3, 256, %s46_s22, [#allocation6], %s3284_s15, %s3284_s15, %s3285_s16  }
  0x17   :  { %s3116_s21 = scalar_lea.hbm %s3905_s5, 512 }
  0x18   :  { %p3117_p8 = scmp.ne.s32.totalorder %s3905_s5, %s3116_s21  ;;  %p3120_p9 = scmp.lt.u32.totalorder %s3116_s21, %s3905_s5 }
  0x1a   :  { %p3122_p10 = pnand %p3120_p9, %p3117_p8 }
  0x1c   :  { %3125 = shalt.err (!%p3122_p10)
}
  0x1d   :  { %s3126_s28 = scalar_lea.vmem %s3362_s24, 512  ;;  %p3131_p12 = scmp.lt.s32.totalorder %s3362_s24, %s3362_s24 }
  0x1e   :  { %p3127_p11 = scmp.ne.s32.totalorder %s3362_s24, %s3126_s28  ;;  %p3132_p13 = scmp.lt.s32.totalorder %s3126_s28, %s3126_s28 }
  0x20   :  { %p3133_p0 = por %p3132_p13, %p3131_p12 }
  0x22   :  { %p3134_p1 = pnand %p3133_p0, %p3127_p11 }
  0x24   :  { %3137 = shalt.err (!%p3134_p1)
}
  0x25   :  { %75 = dma.hbm_to_vmem [thread:$0]  %s3905_s5, 512, %s3362_s24, [#allocation9], %s3284_s15, %s3284_s15, %s3285_s16  }
  0x26   :  { %s3286_s29 = smov [#allocation2]   ;;  %s3287_s13 = smov [#allocation7]  }
  0x27   :  { %s33_s30 = sshll.u32 %s3286_s29, 4  ;;  %s57_s14 = sshll.u32 %s3287_s13, 4  ;;  %s34_s30 = int_to_ptr.vmem [resolvable:$true] %s33_s30  ;;  %s3399_s14 = int_to_ptr.vmem [resolvable:$true] %s57_s14 }
  0x28   :  { %s3138_s19 = scalar_lea.hbm %s3902_s2, 256 }
  0x29   :  { %p3139_p2 = scmp.ne.s32.totalorder %s3902_s2, %s3138_s19  ;;  %p3142_p3 = scmp.lt.u32.totalorder %s3138_s19, %s3902_s2 }
  0x2b   :  { %p3144_p4 = pnand %p3142_p3, %p3139_p2 }
  0x2d   :  { %3147 = shalt.err (!%p3144_p4)
}
  0x2e   :  { %s3148_s5 = scalar_lea.vmem %s34_s30, 256  ;;  %p3153_p6 = scmp.lt.s32.totalorder %s34_s30, %s34_s30 }
  0x2f   :  { %p3149_p5 = scmp.ne.s32.totalorder %s34_s30, %s3148_s5  ;;  %p3154_p7 = scmp.lt.s32.totalorder %s3148_s5, %s3148_s5 }
  0x31   :  { %p3155_p8 = por %p3154_p7, %p3153_p6 }
  0x33   :  { %p3156_p9 = pnand %p3155_p8, %p3149_p5 }
  0x35   :  { %3159 = shalt.err (!%p3156_p9)
}
  0x36   :  { %39 = dma.hbm_to_vmem [thread:$0]  %s3902_s2, 256, %s34_s30, [#allocation3], %s3284_s15, %s3284_s15, %s3285_s16  }
  0x37   :  { %s3160_s3 = scalar_lea.hbm %s3904_s4, 384 }
  0x38   :  { %p3161_p10 = scmp.ne.s32.totalorder %s3904_s4, %s3160_s3  ;;  %p3164_p11 = scmp.lt.u32.totalorder %s3160_s3, %s3904_s4 }
  0x3a   :  { %p3166_p12 = pnand %p3164_p11, %p3161_p10 }
  0x3c   :  { %3169 = shalt.err (!%p3166_p12)
}
  0x3d   :  { %s3170_s18 = scalar_lea.vmem %s3399_s14, 384  ;;  %p3175_p0 = scmp.lt.s32.totalorder %s3399_s14, %s3399_s14 }
  0x3e   :  { %p3171_p13 = scmp.ne.s32.totalorder %s3399_s14, %s3170_s18  ;;  %p3176_p1 = scmp.lt.s32.totalorder %s3170_s18, %s3170_s18 }
  0x40   :  { %p3177_p2 = por %p3176_p1, %p3175_p0 }
  0x42   :  { %p3178_p3 = pnand %p3177_p2, %p3171_p13 }
  0x44   :  { %3181 = shalt.err (!%p3178_p3)
}
  0x45   :  { %63 = dma.hbm_to_vmem [thread:$0]  %s3904_s4, 384, %s3399_s14, [#allocation6], %s3284_s15, %s3284_s15, %s3285_s16  }
  0x46   :  { %s3288_s19 = smov [#allocation10]   ;;  %s3289_s21 = smov [#allocation11]  }
  0x47   :  { %s85_s20 = sshll.u32 %s3288_s19, 4  ;;  %s97_s23 = sshll.u32 %s3289_s21, 4  ;;  %s86_s20 = int_to_ptr.vmem [resolvable:$true] %s85_s20  ;;  %s3436_s23 = int_to_ptr.vmem [resolvable:$true] %s97_s23 }
  0x48   :  { %s3182_s24 = scalar_lea.hbm %s3908_s8, 2048 }
  0x49   :  { %p3183_p4 = scmp.ne.s32.totalorder %s3908_s8, %s3182_s24  ;;  %p3186_p5 = scmp.lt.u32.totalorder %s3182_s24, %s3908_s8 }
  0x4b   :  { %p3188_p6 = pnand %p3186_p5, %p3183_p4 }
  0x4d   :  { %3191 = shalt.err (!%p3188_p6)
}
  0x4e   :  { %s3192_s4 = scalar_lea.vmem %s86_s20, 2048  ;;  %p3197_p8 = scmp.lt.s32.totalorder %s86_s20, %s86_s20 }
  0x4f   :  { %p3193_p7 = scmp.ne.s32.totalorder %s86_s20, %s3192_s4  ;;  %p3198_p9 = scmp.lt.s32.totalorder %s3192_s4, %s3192_s4 }
  0x51   :  { %p3199_p10 = por %p3198_p9, %p3197_p8 }
  0x53   :  { %p3200_p11 = pnand %p3199_p10, %p3193_p7 }
  0x55   :  { %3203 = shalt.err (!%p3200_p11)
}
  0x56   :  { %91 = dma.hbm_to_vmem [thread:$0]  %s3908_s8, 2048, %s86_s20, [#allocation9], %s3284_s15, %s3284_s15, %s3285_s16  }
  0x57   :  { %s3204_s17 = scalar_lea.hbm %s3909_s9, 2048 }
  0x58   :  { %p3205_p12 = scmp.ne.s32.totalorder %s3909_s9, %s3204_s17  ;;  %p3208_p13 = scmp.lt.u32.totalorder %s3204_s17, %s3909_s9 }
  0x5a   :  { %p3210_p0 = pnand %p3208_p13, %p3205_p12 }
  0x5c   :  { %3213 = shalt.err (!%p3210_p0)
}
  0x5d   :  { %s3214_s21 = scalar_lea.vmem %s3436_s23, 2048  ;;  %p3219_p2 = scmp.lt.s32.totalorder %s3436_s23, %s3436_s23 }
  0x5e   :  { %p3215_p1 = scmp.ne.s32.totalorder %s3436_s23, %s3214_s21  ;;  %p3220_p3 = scmp.lt.s32.totalorder %s3214_s21, %s3214_s21 }
  0x60   :  { %p3221_p4 = por %p3220_p3, %p3219_p2 }
  0x62   :  { %p3222_p5 = pnand %p3221_p4, %p3215_p1 }
  0x64   :  { %3225 = shalt.err (!%p3222_p5)
}
  0x65   :  { %103 = dma.hbm_to_vmem [thread:$0]  %s3909_s9, 2048, %s3436_s23, [#allocation12], %s3284_s15, %s3284_s15, %s3285_s16  }
  0x66   :  { %3270 = dma.done.wait [#allocation3], 256  }
  0x67   :  { %3271 = vsyncadd [#allocation3], 4294967040 }
  0x68   :  { %3272 = dma.done.wait [#allocation6], 640  }
  0x69   :  { %3273 = vsyncadd [#allocation6], 4294966656 }
  0x6a   :  { %3274 = dma.done.wait [#allocation9], 2560  }
  0x6b   :  { %3275 = vsyncadd [#allocation9], 4294964736 }
  0x6c   :  { %3276 = dma.done.wait [#allocation12], 2048  }
  0x6d   :  { %3277 = vsyncadd [#allocation12], 4294965248  ;;  %v3290_v0 = vmov 0   ;;  %v148_v1 = vld [vmem:[%s3900_s0] sm:$0xff]  ;;  %v149_v3 = vld [vmem:[%s3900_s0 + $0x8] sm:$0xff]  ;;  %v3291_v13 = vmov 0.0|0.0   ;;  %v125_v18 = vlaneseq }
  0x6e   :  { %3005 = vset.pattern.permute.xlu1 %v3290_v0  ;;  %3004 = vset.pattern.permute.xlu0 %v3290_v0  ;;  %v127_v2 = vld [vmem:[%s3901_s1] sm:$0xff]  ;;  %v128_v4 = vld [vmem:[%s3901_s1 + $0x8] sm:$0xff]  ;;  %v150_v5 = vld [vmem:[%s3900_s0 + $0x10] sm:$0xff]  ;;  %v3292_v17 = vmov 0.0   ;;  %vm197_vm4 = vcmask 130048   ;;  %vm3293_vm7 = vmmov 0  }
  0x6f   :  { %152 = vperm.xlu1 %3005, %v148_v1   ;;  %131 = vperm.xlu0 %3004, %v127_v2   ;;  %v129_v6 = vld [vmem:[%s3901_s1 + $0x10] sm:$0xff]  ;;  %v3491_v7 = vld [vmem:[#allocation2] sm:$0xff]  ;;  %v3493_v8 = vld [vmem:[#allocation2 + $0x8] sm:$0xff]  ;;  %v126_v19 = vand.u32 127, %v125_v18  ;;  %vm252_vm8 = vcmask 261120   ;;  %vm351_vm9 = vcmask 523264  }
  0x70   :  { %v196_v9 = vpack.c.bf16 %v3493_v8, %v3491_v7  ;;  %v183_v10 = vld [vmem:[#allocation8] sm:$0xff]  ;;  %v184_v11 = vld [vmem:[#allocation8 + $0x8] sm:$0xff]  ;;  %v185_v12 = vld [vmem:[#allocation8 + $0x10] sm:$0xff]  ;;  %2809 = vmatprep.subr.bf16.mxu1 %v3291_v13  ;;  %2535 = vmatprep.mubr.msk.f32.mxu1 %vm3293_vm7, %v3292_v17  ;;  %vm496_vm10 = vcmask 1043456   ;;  %vm492_vm11 = vcmask 195584  }
  0x71   :  { %v3498_v14 = vpack.c.bf16 %v184_v11, %v183_v10  ;;  %v186_v15 = vld [vmem:[#allocation8 + $0x18] sm:$0xff]  ;;  %v187_v38 = vld [vmem:[%s3906_s6] sm:$0xff]  ;;  %v188_v39 = vld [vmem:[%s3906_s6 + $0x8] sm:$0xff] }
  0x72   :  { %2521 = vmatprep.subr.bf16.mxu0 %v196_v9  ;;  %v3502_v16 = vpack.c.bf16 %v186_v15, %v185_v12  ;;  %v189_v40 = vld [vmem:[%s3906_s6 + $0x10] sm:$0xff]  ;;  %v3545_v41 = vpack.c.bf16 %v188_v39, %v187_v38  ;;  %v190_v42 = vld [vmem:[%s3906_s6 + $0x18] sm:$0xff]  ;;  %v191_v44 = vld [vmem:[%s3906_s6 + $0x20] sm:$0xff] }
  0x73   :  { %155 = vperm.xlu1 %3005, %v149_v3   ;;  %134 = vperm.xlu0 %3004, %v128_v4   ;;  %v3551_v43 = vpack.c.bf16 %v190_v42, %v189_v40  ;;  %v192_v45 = vld [vmem:[%s3906_s6 + $0x28] sm:$0xff]  ;;  %v193_v51 = vld [vmem:[%s3906_s6 + $0x30] sm:$0xff]  ;;  %v194_v52 = vld [vmem:[%s3906_s6 + $0x38] sm:$0xff] }
  0x74   :  { %2522 = vmatpush3.bf16.msra.mxu0 %v196_v9  ;;  %2811 = vmatpush3.bf16.msra.mxu1 %v3498_v14  ;;  %v3561_v46 = vpack.c.bf16 %v192_v45, %v191_v44  ;;  %v3581_v53 = vpack.c.bf16 %v194_v52, %v193_v51  ;;  %v3584_v54 = vld [vmem:[#allocation7] sm:$0xff]  ;;  %v3587_v58 = vld [vmem:[#allocation7 + $0x8] sm:$0xff]  ;;  %v3591_v63 = vld [vmem:[#allocation7 + $0x10] sm:$0xff] }
  0x75   :  { %2815 = vmatprep.subr.bf16.mxu0 %v3291_v13  ;;  %2812 = vmatprep.subr.bf16.mxu1 %v3291_v13  ;;  %v726_v39 = vld [vmem:[#allocation11 + $0x20] sm:$0xff]  ;;  %v727_v40 = vld [vmem:[#allocation11 + $0x28] sm:$0xff]  ;;  %v728_v44 = vld [vmem:[#allocation11 + $0x30] sm:$0xff] }
  0x76   :  { %v3613_v42 = vpack.c.bf16 %v727_v40, %v726_v39  ;;  %v729_v45 = vld [vmem:[#allocation11 + $0x38] sm:$0xff]  ;;  %v723_v51 = vld [vmem:[#allocation10 + $0x30] sm:$0xff]  ;;  %v891_v40 = vld [vmem:[#allocation10 + $0x40] sm:$0xff] }
  0x77   :  { %158 = vperm.xlu1 %3005, %v150_v5   ;;  %137 = vperm.xlu0 %3004, %v129_v6   ;;  %v3605_v5 = vld [vmem:[%s3907_s7] ss:$0 sm:$0xff]  ;;  %s3294_s7 = smov 96   ;;  %v724_v52 = vld [vmem:[#allocation10 + $0x38] sm:$0xff] }
  0x78   :  { %2814 = vmatpush3.bf16.msra.mxu1 %v3502_v16 }
  0x79   :  { %2569 = vmatprep.subr.bf16.mxu1 %v3292_v17 }
  0xee   :  { %v153_v20 = vpop.permute.xlu1 %152  ;;  %v132_v21 = vpop.permute.xlu0 %131 }
  0xef   :  { %vm160_vm0 = vcmp.eq.s32.totalorder %v126_v19, %v153_v20  ;;  %vm139_vm1 = vcmp.eq.s32.totalorder %v126_v19, %v132_v21 }
  0xf0   :  { %v2298_v22 = vsel %vm160_vm0, 1.0, %v3292_v17  ;;  %v3509_v23 = vsel %vm139_vm1, 1.0, %v3292_v17 }
  0xf1   :  { %v169_v28 = vsub.f32 %v2298_v22, %v3509_v23 }
  0xf2   :  { %v156_v24 = vpop.permute.xlu1 %155  ;;  %v135_v25 = vpop.permute.xlu0 %134 }
  0xf3   :  { %vm161_vm2 = vcmp.eq.s32.totalorder %v126_v19, %v156_v24  ;;  %vm140_vm3 = vcmp.eq.s32.totalorder %v126_v19, %v135_v25 }
  0xf4   :  { %v2299_v26 = vsel %vm161_vm2, 1.0, %v3292_v17  ;;  %v3513_v27 = vsel %vm140_vm3, 1.0, %v3292_v17 }
  0xf5   :  { %v170_v29 = vsub.f32 %v2299_v26, %v3513_v27  ;;  %v174_v30 = vpack.c.bf16 %v3513_v27, %v3509_v23 }
  0xf6   :  { %v159_v31 = vpop.permute.xlu1 %158  ;;  %v138_v32 = vpop.permute.xlu0 %137 }
  0xf7   :  { %vm162_vm5 = vcmp.eq.s32.totalorder %v126_v19, %v159_v31  ;;  %vm141_vm6 = vcmp.eq.s32.totalorder %v126_v19, %v138_v32  ;;  %v3519_v33 = vpack.c.bf16 %v170_v29, %v169_v28 }
  0xf8   :  { %v2300_v34 = vsel %vm162_vm5, 1.0, %v3292_v17  ;;  %v3523_v35 = vsel %vm141_vm6, 1.0, %v3292_v17 }
  0xf9   :  { %v171_v36 = vsub.f32 %v2300_v34, %v3523_v35  ;;  %2523 = vmatprep.mubr.msk.bf16.mxu0 %vm197_vm4, %v3519_v33 }
  0xfb   :  { %v3528_v37 = vpack.c.bf16 %v171_v36, %v171_v36 }
  0xfd   :  { %2524 = vmatmul.mubr.msk.bf16.vlgmr.msra.gmra.mrb[0].mxu0 %vm197_vm4, %v3528_v37 }
  0xfe   :  { %2560 = vmatprep.mubr.msk.f32.mxu0 %vm3293_vm7, %v3292_v17  ;;  %2817 = vmatpush3.bf16.msra.mxu0 %v3545_v41 }
  0xff   :  { %2818 = vmatprep.subr.bf16.mxu0 %v3291_v13 }
 0x102   :  { %2820 = vmatpush3.bf16.msra.mxu0 %v3551_v43 }
 0x103   :  { %2821 = vmatprep.subr.bf16.mxu0 %v3291_v13 }
 0x106   :  { %2823 = vmatpush3.bf16.msra.mxu0 %v3561_v46 }
 0x107   :  { %2824 = vmatprep.subr.bf16.mxu0 %v3291_v13 }
 0x10a   :  { %2826 = vmatpush3.bf16.msra.mxu0 %v3581_v53 }
 0x10b   :  { %2844 = vmatprep.subr.bf16.mxu0 %v3613_v42 }
 0x1d0   :  { %v2525_v47 = vpop.f32.mrb[0].mxu0 }
 0x1d1   :  { %v238_v48 = vpop.f32.mrb[1].mxu0 }
 0x1d2   :  { %v2526_v49 = vpop.f32.mrb[2].mxu0  ;;  %2536 = vmatmul.mubr.msk.f32.vlgmr.msra.gmra.mrb[0].mxu1 %vm252_vm8, %v238_v48  ;;  %v721_v48 = vld [vmem:[#allocation10 + $0x20] sm:$0xff] }
 0x1d3   :  { %v241_v50 = vpop.f32.mrb[3].mxu0  ;;  %2538 = vmatprep.mubr.msk.f32.mxu1 %vm3293_vm7, %v3292_v17  ;;  %v722_v49 = vld [vmem:[#allocation10 + $0x28] sm:$0xff] }
 0x1d6   :  { %2539 = vmatmul.mubr.msk.f32.gmra.mrb[2].mxu1 %vm252_vm8, %v241_v50  ;;  %v3620_v50 = vpack.c.bf16 %v722_v49, %v721_v48  ;;  %v1061_v48 = vld [vmem:[#allocation10 + $0x60] sm:$0xff]  ;;  %v1062_v49 = vld [vmem:[#allocation10 + $0x68] sm:$0xff] }
 0x1d7   :  { %2541 = vmatprep.mubr.msk.f32.mxu1 %vm3293_vm7, %v3292_v17 }
 0x1da   :  { %2542 = vmatmul.mubr.msk.f32.gmra.mrb[4].mxu1 %vm252_vm8, %v2525_v47  ;;  %v3615_v47 = vpack.c.bf16 %v729_v45, %v728_v44  ;;  %v892_v45 = vld [vmem:[#allocation10 + $0x48] sm:$0xff] }
 0x1db   :  { %2573 = vmatprep.mubr.msk.bf16.mxu1 %vm3293_vm7, %v3292_v17 }
 0x2a5   :  { %v328_v55 = vpop.f32.mrb[0].mxu1 }
 0x2a6   :  { %v329_v56 = vadd.f32 %v328_v55, %v3584_v54  ;;  %v2537_v57 = vpop.f32.mrb[1].mxu1  ;;  %v3624_v55 = vpack.c.bf16 %v724_v52, %v723_v51  ;;  %v3680_v52 = vpack.c.bf16 %v892_v45, %v891_v40 }
 0x2a8   :  { %v342_v59 = vmax.f32 %v329_v56, 0.0  ;;  %v175_v56 = vpack.c.bf16 %v3523_v35, %v3523_v35  ;;  %v548_v35 = vld [vmem:[#allocation11 + $0x18] sm:$0xff] }
 0x2a9   :  { %v333_v60 = vpop.f32.mrb[2].mxu1 }
 0x2aa   :  { %v334_v61 = vadd.f32 %v333_v60, %v3587_v58  ;;  %v2540_v62 = vpop.f32.mrb[3].mxu1  ;;  %2561 = vmatmul.mubr.msk.f32.vlgmr.msra.gmra.mrb[4].mxu0 %vm351_vm9, %v342_v59 }
 0x2ab   :  { %2563 = vmatprep.mubr.msk.f32.mxu0 %vm3293_vm7, %v3292_v17  ;;  %2846 = vmatpush3.bf16.msra.mxu0 %v3613_v42 }
 0x2ac   :  { %v343_v0 = vmax.f32 %v334_v61, 0.0  ;;  %2848 = vmatprep.subr.bf16.mxu0 %v3615_v47 }
 0x2ad   :  { %v338_v1 = vpop.f32.mrb[4].mxu1 }
 0x2ae   :  { %v339_v2 = vadd.f32 %v338_v1, %v3591_v63  ;;  %v2543_v3 = vpop.f32.mrb[5].mxu1  ;;  %2564 = vmatmul.mubr.msk.f32.gmra.mrb[6].mxu0 %vm351_vm9, %v343_v0  ;;  %v545_v1 = vld [vmem:[#allocation11] sm:$0xff] }
 0x2af   :  { %2566 = vmatprep.mubr.msk.f32.mxu0 %vm3293_vm7, %v3292_v17  ;;  %2850 = vmatpush3.bf16.msra.mxu0 %v3615_v47 }
 0x2b0   :  { %v344_v4 = vmax.f32 %v339_v2, 0.0  ;;  %2852 = vmatprep.subr.bf16.mxu0 %v3620_v50  ;;  %v546_v2 = vld [vmem:[#allocation11 + $0x8] sm:$0xff] }
 0x2b1   :  { %v3637_v23 = vpack.c.bf16 %v546_v2, %v545_v1 }
 0x2b2   :  { %2567 = vmatmul.mubr.msk.f32.gmra.mrb[8].mxu0 %vm351_vm9, %v344_v4 }
 0x2b3   :  { %2607 = vmatprep.mubr.msk.f32.mxu0 %vm252_vm8, %v3491_v7 }
 0x2b6   :  { %2608 = vmatmul.mubr.msk.f32.vlgmr.msra.gmra.mrb[10].mxu0 %vm252_vm8, %v3493_v8 }
 0x2b7   :  { %2854 = vmatpush3.bf16.msra.mxu0 %v3620_v50 }
 0x2b8   :  { %2856 = vmatprep.subr.bf16.mxu0 %v3624_v55 }
 0x2bb   :  { %2858 = vmatpush3.bf16.msra.mxu0 %v3624_v55 }
 0x37d   :  { %v427_v6 = vpop.f32.mrb[4].mxu0 }
 0x37e   :  { %v428_v9 = vadd.f32 %v3605_v5, %v427_v6  ;;  %v2562_v10 = vpop.f32.mrb[5].mxu0 }
 0x37f   :  { %v541_v10 = vld [vmem:[#allocation10] sm:$0xff] }
 0x380   :  { %v2310_v11 = vmul.f32 -1.442695, %v428_v9 }
 0x381   :  { %v432_v12 = vpop.f32.mrb[6].mxu0 }
 0x382   :  { %3006 = vpow2.f32 %v2310_v11  ;;  %v433_v15 = vadd.f32 %v3605_v5, %v432_v12  ;;  %v2565_v18 = vpop.f32.mrb[7].mxu0  ;;  %v542_v11 = vld [vmem:[#allocation10 + $0x8] sm:$0xff] }
 0x383   :  { %v3651_v12 = vpack.c.bf16 %v542_v11, %v541_v10  ;;  %v544_v18 = vld [vmem:[#allocation10 + $0x18] sm:$0xff] }
 0x384   :  { %v2311_v19 = vmul.f32 -1.442695, %v433_v15 }
 0x385   :  { %v437_v20 = vpop.f32.mrb[8].mxu0 }
 0x386   :  { %3008 = vpow2.f32 %v2311_v19  ;;  %v438_v21 = vadd.f32 %v3605_v5, %v437_v20  ;;  %v2568_v22 = vpop.f32.mrb[9].mxu0  ;;  %v896_v20 = vld [vmem:[#allocation11 + $0x40] sm:$0xff] }
 0x387   :  { %v1066_v22 = vld [vmem:[#allocation11 + $0x60] sm:$0xff] }
 0x388   :  { %v2312_v24 = vmul.f32 -1.442695, %v438_v21 }
 0x38a   :  { %3010 = vpow2.f32 %v2312_v24 }
 0x38c   :  { %v3007_v25 = vpop.eup %3006 }
 0x38d   :  { %v450_v26 = vadd.f32 1.0, %v3007_v25  ;;  %v1067_v25 = vld [vmem:[#allocation11 + $0x68] sm:$0xff] }
 0x38f   :  { %3012 = vrcp.f32 %v450_v26  ;;  %v3664_v26 = vpack.c.bf16 %v1067_v25, %v1066_v22 }
 0x390   :  { %v3009_v28 = vpop.eup %3008 }
 0x391   :  { %v451_v29 = vadd.f32 1.0, %v3009_v28  ;;  %2876 = vmatprep.subr.bf16.mxu0 %v3664_v26  ;;  %v898_v28 = vld [vmem:[#allocation11 + $0x50] sm:$0xff] }
 0x393   :  { %3014 = vrcp.f32 %v451_v29  ;;  %v899_v29 = vld [vmem:[#allocation11 + $0x58] sm:$0xff] }
 0x394   :  { %v3011_v31 = vpop.eup %3010 }
 0x395   :  { %v452_v32 = vadd.f32 1.0, %v3011_v31  ;;  %v1068_v31 = vld [vmem:[#allocation11 + $0x70] sm:$0xff] }
 0x397   :  { %3016 = vrcp.f32 %v452_v32  ;;  %v1069_v32 = vld [vmem:[#allocation11 + $0x78] sm:$0xff] }
 0x398   :  { %v3672_v39 = vpack.c.bf16 %v1069_v32, %v1068_v31 }
 0x399   :  { %v3013_v34 = vpop.eup %3012 }
 0x39a   :  { %462 = vrot.lane.b32.xlu0 %v3013_v34, %s3294_s7 }
 0x39d   :  { %v3015_v36 = vpop.eup %3014 }
 0x39e   :  { %464 = vrot.lane.b32.xlu1 %v3015_v36, %s3294_s7 }
 0x3a1   :  { %v3017_v38 = vpop.eup %3016 }
 0x3a2   :  { %466 = vrot.lane.b32.xlu0 %v3017_v38, %s3294_s7  ;;  %v3670_v38 = vpack.c.bf16 %v899_v29, %v898_v28 }
 0x3c1   :  { %476 = vxpose.xlu1.c.b16.start [1/2] (short) (narrow) %v174_v30, 16  ;;  %v547_v30 = vld [vmem:[#allocation11 + $0x10] sm:$0xff] }
 0x3c2   :  { %v3641_v6 = vpack.c.bf16 %v548_v35, %v547_v30 }
 0x3c5   :  { %477 = vxpose.xlu1.c.b16.end [2/2] (short) (narrow) %v175_v56, 16  ;;  %v3682_v56 = vpack.c.bf16 %v1062_v49, %v1061_v48 }
 0x40c   :  { %v463_v57 = vpop.permute.xlu0 %462 }
 0x40d   :  { %v471_v60 = vmul.f32 %v463_v57, %v428_v9  ;;  %v893_v57 = vld [vmem:[#allocation10 + $0x50] sm:$0xff] }
 0x410   :  { %v465_v59 = vpop.permute.xlu1 %464 }
 0x411   :  { %v472_v61 = vmul.f32 %v465_v59, %v433_v15  ;;  %v543_v15 = vld [vmem:[#allocation10 + $0x10] sm:$0xff]  ;;  %v894_v59 = vld [vmem:[#allocation10 + $0x58] sm:$0xff] }
 0x412   :  { %v3655_v19 = vpack.c.bf16 %v544_v18, %v543_v15  ;;  %v3736_v18 = vld [vmem:[%s3910_s10 + $0x2] ss:$0 sm:$0xff] }
 0x413   :  { %v474_v62 = vpack.c.bf16 %v472_v61, %v471_v60  ;;  %v1063_v60 = vld [vmem:[#allocation10 + $0x70] sm:$0xff]  ;;  %v1064_v61 = vld [vmem:[#allocation10 + $0x78] sm:$0xff] }
 0x414   :  { %v467_v0 = vpop.permute.xlu0 %466 }
 0x415   :  { %v473_v3 = vmul.f32 %v467_v0, %v438_v21  ;;  %2570 = vmatpush3.bf16.msra.mxu1 %v474_v62  ;;  %v897_v21 = vld [vmem:[#allocation11 + $0x48] sm:$0xff]  ;;  %v3692_v62 = vpack.c.bf16 %v894_v59, %v893_v57  ;;  %v3694_v0 = vpack.c.bf16 %v1064_v61, %v1063_v60  ;;  %v179_v61 = vld [vmem:[#allocation5 + $0x8] sm:$0xff] }
 0x416   :  { %2571 = vmatprep.subr.bf16.mxu1 %v3292_v17  ;;  %v3662_v24 = vpack.c.bf16 %v897_v21, %v896_v20  ;;  %v3741_v20 = vld [vmem:[%s3910_s10 + $0x3] ss:$0 sm:$0xff] }
 0x417   :  { %v475_v4 = vpack.c.bf16 %v473_v3, %v473_v3 }
 0x419   :  { %v498_v27 = vsel %vm496_vm10, %v475_v4, 0 }
 0x41a   :  { %2572 = vmatpush3.bf16.msra.mxu1 %v498_v27 }
 0x41b   :  { %2828 = vmatprep.subr.bf16.mxu1 %v3637_v23 }
 0x427   :  { %v3643_v9 = vpop.trf.xlu1 }
 0x428   :  { %2574 = vmatmul.mubr.msk.bf16.vlgmr.msra.gmra.mrb[8].mxu1 %vm492_vm11, %v3643_v9 }
 0x429   :  { %2830 = vmatpush3.bf16.msra.mxu1 %v3637_v23  ;;  %2585 = vmatprep.mubr.msk.f32.mxu1 %vm252_vm8, %v3491_v7 }
 0x42a   :  { %2832 = vmatprep.subr.bf16.mxu1 %v3641_v6 }
 0x42d   :  { %2834 = vmatpush3.bf16.msra.mxu1 %v3641_v6 }
 0x42e   :  { %2836 = vmatprep.subr.bf16.mxu1 %v3651_v12 }
 0x430   :  { %2586 = vmatmul.mubr.msk.f32.vlgmr.msra.gmra.mrb[6].mxu1 %vm252_vm8, %v3493_v8 }
 0x431   :  { %2838 = vmatpush3.bf16.msra.mxu1 %v3651_v12 }
 0x432   :  { %2840 = vmatprep.subr.bf16.mxu1 %v3655_v19 }
 0x435   :  { %2842 = vmatpush3.bf16.msra.mxu1 %v3655_v19 }
 0x436   :  { %2860 = vmatprep.subr.bf16.mxu1 %v3662_v24 }
 0x4fb   :  { %v534_v34 = vpop.f32.mrb[8].mxu1 }
 0x4fc   :  { %v2575_v36 = vpop.f32.mrb[9].mxu1  ;;  %2596 = vmatprep.mubr.msk.f32.mxu1 %vm252_vm8, %v534_v34  ;;  %2618 = vmatprep.mubr.msk.f32.mxu0 %vm252_vm8, %v534_v34 }
 0x4fd   :  { %v537_v44 = vpop.f32.mrb[10].mxu1 }
 0x4fe   :  { %v2576_v51 = vpop.f32.mrb[11].mxu1  ;;  %2597 = vmatmul.mubr.msk.f32.vlgmr.msra.gmra.mrb[6].mxu1 %vm252_vm8, %v537_v44  ;;  %2619 = vmatmul.mubr.msk.f32.vlgmr.msra.gmra.mrb[10].mxu0 %vm252_vm8, %v537_v44 }
 0x4ff   :  { %2862 = vmatpush3.bf16.msra.mxu1 %v3662_v24  ;;  %2878 = vmatpush3.bf16.msra.mxu0 %v3664_v26 }
 0x500   :  { %2864 = vmatprep.subr.bf16.mxu1 %v3670_v38  ;;  %2880 = vmatprep.subr.bf16.mxu0 %v3672_v39 }
 0x501   :  { %2629 = vmatprep.mubr.msk.f32.mxu1 %vm252_vm8, %v3491_v7  ;;  %2651 = vmatprep.mubr.msk.f32.mxu0 %vm252_vm8, %v3491_v7  ;;  %v3722_v7 = vld [vmem:[%s3910_s10] ss:$0 sm:$0xff] }
 0x503   :  { %2866 = vmatpush3.bf16.msra.mxu1 %v3670_v38  ;;  %2882 = vmatpush3.bf16.msra.mxu0 %v3672_v39 }
 0x504   :  { %2868 = vmatprep.subr.bf16.mxu1 %v3680_v52  ;;  %2884 = vmatprep.subr.bf16.mxu0 %v3682_v56 }
 0x506   :  { %2630 = vmatmul.mubr.msk.f32.vlgmr.msra.gmra.mrb[12].mxu1 %vm252_vm8, %v3493_v8  ;;  %2652 = vmatmul.mubr.msk.f32.vlgmr.msra.gmra.mrb[12].mxu0 %vm252_vm8, %v3493_v8  ;;  %v3727_v8 = vld [vmem:[%s3910_s10 + $0x1] ss:$0 sm:$0xff]  ;;  %s3295_s10 = smov [#allocation14]  }
 0x507   :  { %2870 = vmatpush3.bf16.msra.mxu1 %v3680_v52  ;;  %2640 = vmatprep.mubr.msk.f32.mxu1 %vm252_vm8, %v534_v34  ;;  %s2276_s1 = sshll.u32 %s3295_s10, 4  ;;  %s2277_s1 = int_to_ptr.vmem [resolvable:$true] %s2276_s1 }
 0x508   :  { %2886 = vmatpush3.bf16.msra.mxu0 %v3682_v56  ;;  %2662 = vmatprep.mubr.msk.f32.mxu0 %vm252_vm8, %v534_v34  ;;  %s3226_s29 = scalar_lea.vmem %s2277_s1, 256  ;;  %p3231_p7 = scmp.lt.s32.totalorder %s2277_s1, %s2277_s1 }
 0x509   :  { %2872 = vmatprep.subr.bf16.mxu1 %v3692_v62  ;;  %2888 = vmatprep.subr.bf16.mxu0 %v3694_v0  ;;  %p3227_p6 = scmp.ne.s32.totalorder %s2277_s1, %s3226_s29  ;;  %p3232_p8 = scmp.lt.s32.totalorder %s3226_s29, %s3226_s29 }
 0x50b   :  { %2874 = vmatpush3.bf16.msra.mxu1 %v3692_v62  ;;  %p3233_p9 = por %p3232_p8, %p3231_p7 }
 0x50c   :  { %2890 = vmatpush3.bf16.msra.mxu0 %v3694_v0 }
 0x50d   :  { %2891 = vmatprep.subr.bf16.mxu0 %v3291_v13  ;;  %p3234_p10 = pnand %p3233_p9, %p3227_p6 }
 0x50e   :  { %2641 = vmatmul.mubr.msk.f32.vlgmr.msra.gmra.mrb[12].mxu1 %vm252_vm8, %v537_v44 }
 0x50f   :  { %2663 = vmatmul.mubr.msk.f32.vlgmr.msra.gmra.mrb[12].mxu0 %vm252_vm8, %v537_v44  ;;  %2667 = vmatprep.mubr.msk.bf16.mxu1 %vm197_vm4, %v3519_v33 }
 0x510   :  { %2893 = vmatpush3.bf16.msra.mxu0 %v3498_v14  ;;  %2679 = vmatprep.mubr.msk.f32.mxu0 %vm3293_vm7, %v3292_v17 }
 0x511   :  { %2894 = vmatprep.subr.bf16.mxu0 %v3291_v13 }
 0x514   :  { %2896 = vmatpush3.bf16.msra.mxu0 %v3502_v16 }
 0x515   :  { %2713 = vmatprep.subr.bf16.mxu0 %v3292_v17 }
 0x5d1   :  { %v2598_v14 = vpop.f32.mrb[6].mxu1  ;;  %v2620_v33 = vpop.f32.mrb[10].mxu0 }
 0x5d2   :  { %v719_v1 = vadd.f32 %v2598_v14, %v3722_v7  ;;  %v889_v2 = vadd.f32 %v2620_v33, %v3727_v8  ;;  %v702_v3 = vpop.f32.mrb[7].mxu1  ;;  %v871_v16 = vpop.f32.mrb[11].mxu0 }
 0x5d3   :  { %v718_v4 = vadd.f32 %v3722_v7, %v702_v3  ;;  %v888_v27 = vadd.f32 %v3727_v8, %v871_v16 }
 0x5d4   :  { %v2338_v30 = vmul.f32 -1.442695, %v719_v1  ;;  %v2340_v35 = vmul.f32 -1.442695, %v889_v2  ;;  %v178_v1 = vld [vmem:[#allocation5] sm:$0xff] }
 0x5d5   :  { %v2337_v10 = vmul.f32 -1.442695, %v718_v4  ;;  %v2339_v11 = vmul.f32 -1.442695, %v888_v27 }
 0x5d6   :  { %3018 = vpow2.f32 %v2338_v30 }
 0x5d7   :  { %3020 = vpow2.f32 %v2340_v35 }
 0x5d8   :  { %3022 = vpow2.f32 %v2337_v10 }
 0x5d9   :  { %3024 = vpow2.f32 %v2339_v11 }
 0x5e0   :  { %v3019_v15 = vpop.eup %3018 }
 0x5e1   :  { %v3021_v21 = vpop.eup %3020  ;;  %v1237_v22 = vadd.f32 1.0, %v3019_v15  ;;  %v2642_v25 = vpop.f32.mrb[12].mxu1 }
 0x5e2   :  { %v3023_v28 = vpop.eup %3022  ;;  %v1249_v29 = vadd.f32 1.0, %v3021_v21  ;;  %v2664_v31 = vpop.f32.mrb[12].mxu0  ;;  %v1059_v40 = vadd.f32 %v2642_v25, %v3736_v18 }
 0x5e3   :  { %v1041_v32 = vpop.f32.mrb[13].mxu1  ;;  %v3025_v34 = vpop.eup %3024  ;;  %3026 = vrcp.f32 %v1237_v22  ;;  %v1236_v36 = vadd.f32 1.0, %v3023_v28  ;;  %v1229_v44 = vadd.f32 %v2664_v31, %v3741_v20 }
 0x5e4   :  { %v1211_v45 = vpop.f32.mrb[13].mxu0  ;;  %3028 = vrcp.f32 %v1249_v29  ;;  %v1248_v48 = vadd.f32 1.0, %v3025_v34  ;;  %v1058_v57 = vadd.f32 %v3736_v18, %v1041_v32 }
 0x5e5   :  { %v1228_v49 = vadd.f32 %v3741_v20, %v1211_v45  ;;  %3030 = vrcp.f32 %v1236_v36  ;;  %v2342_v51 = vmul.f32 -1.442695, %v1229_v44 }
 0x5e6   :  { %3032 = vrcp.f32 %v1248_v48 }
 0x5e7   :  { %v2341_v59 = vmul.f32 -1.442695, %v1228_v49  ;;  %3034 = vtanh.f32 %v1059_v40 }
 0x5e8   :  { %3036 = vpow2.f32 %v2342_v51 }
 0x5e9   :  { %3038 = vtanh.f32 %v1058_v57 }
 0x5ea   :  { %3040 = vpow2.f32 %v2341_v59 }
 0x5ed   :  { %v3027_v60 = vpop.eup %3026 }
 0x5ee   :  { %v3029_v14 = vpop.eup %3028 }
 0x5ef   :  { %v3031_v33 = vpop.eup %3030  ;;  %v1269_v3 = vmul.f32 %v3029_v14, %v179_v61 }
 0x5f0   :  { %v3033_v2 = vpop.eup %3032 }
 0x5f1   :  { %v3035_v16 = vpop.eup %3034  ;;  %v1268_v27 = vmul.f32 %v3033_v2, %v178_v1 }
 0x5f2   :  { %v3037_v4 = vpop.eup %3036  ;;  %v1271_v30 = vmul.f32 %v3035_v16, %v3027_v60 }
 0x5f3   :  { %v3039_v35 = vpop.eup %3038  ;;  %v1263_v10 = vadd.f32 1.0, %v3037_v4 }
 0x5f4   :  { %v3041_v11 = vpop.eup %3040  ;;  %v3747_v15 = vadd.f32 %v1271_v30, %v1269_v3  ;;  %v1270_v21 = vmul.f32 %v3039_v35, %v3031_v33 }
 0x5f5   :  { %3042 = vrcp.f32 %v1263_v10  ;;  %v1262_v22 = vadd.f32 1.0, %v3041_v11 }
 0x5f6   :  { %3044 = vtanh.f32 %v3747_v15  ;;  %v3750_v25 = vadd.f32 %v1270_v21, %v1268_v27 }
 0x5f7   :  { %3046 = vrcp.f32 %v1262_v22 }
 0x5f8   :  { %3048 = vtanh.f32 %v3750_v25 }
 0x5ff   :  { %v3043_v28 = vpop.eup %3042 }
 0x600   :  { %v3045_v29 = vpop.eup %3044 }
 0x601   :  { %v3047_v31 = vpop.eup %3046  ;;  %v3753_v32 = vmul.f32 %v3045_v29, %v3043_v28 }
 0x602   :  { %v3049_v34 = vpop.eup %3048 }
 0x603   :  { %v3755_v36 = vmul.f32 %v3049_v34, %v3047_v31 }
 0x605   :  { %v1278_v40 = vpack.c.bf16 %v3753_v32, %v3755_v36 }
 0x607   :  { %2665 = vmatprep.subr.bf16.mxu1 %v1278_v40 }
 0x608   :  { %2666 = vmatpush3.bf16.msra.mxu1 %v1278_v40 }
 0x609   :  { %2897 = vmatprep.subr.bf16.mxu1 %v3291_v13 }
 0x60b   :  { %2668 = vmatmul.mubr.msk.bf16.vlgmr.msra.gmra.mrb[16].mxu1 %vm197_vm4, %v3528_v37 }
 0x60c   :  { %2899 = vmatpush3.bf16.msra.mxu1 %v3545_v41  ;;  %2704 = vmatprep.mubr.msk.f32.mxu1 %vm3293_vm7, %v3292_v17 }
 0x60d   :  { %2900 = vmatprep.subr.bf16.mxu1 %v3291_v13 }
 0x610   :  { %2902 = vmatpush3.bf16.msra.mxu1 %v3551_v43 }
 0x611   :  { %2903 = vmatprep.subr.bf16.mxu1 %v3291_v13 }
 0x614   :  { %2905 = vmatpush3.bf16.msra.mxu1 %v3561_v46 }
 0x615   :  { %2906 = vmatprep.subr.bf16.mxu1 %v3291_v13 }
 0x618   :  { %2908 = vmatpush3.bf16.msra.mxu1 %v3581_v53 }
 0x619   :  { %2926 = vmatprep.subr.bf16.mxu1 %v3613_v42 }
 0x6de   :  { %v2669_v37 = vpop.f32.mrb[16].mxu1 }
 0x6df   :  { %v1313_v44 = vpop.f32.mrb[17].mxu1 }
 0x6e0   :  { %v2670_v41 = vpop.f32.mrb[18].mxu1  ;;  %2680 = vmatmul.mubr.msk.f32.vlgmr.msra.gmra.mrb[14].mxu0 %vm252_vm8, %v1313_v44 }
 0x6e1   :  { %v1316_v45 = vpop.f32.mrb[19].mxu1  ;;  %2682 = vmatprep.mubr.msk.f32.mxu0 %vm3293_vm7, %v3292_v17 }
 0x6e4   :  { %2683 = vmatmul.mubr.msk.f32.gmra.mrb[16].mxu0 %vm252_vm8, %v1316_v45 }
 0x6e5   :  { %2685 = vmatprep.mubr.msk.f32.mxu0 %vm3293_vm7, %v3292_v17 }
 0x6e8   :  { %2686 = vmatmul.mubr.msk.f32.gmra.mrb[18].mxu0 %vm252_vm8, %v2669_v37 }
 0x6e9   :  { %2717 = vmatprep.mubr.msk.bf16.mxu0 %vm3293_vm7, %v3292_v17 }
 0x7b3   :  { %v1402_v13 = vpop.f32.mrb[14].mxu0 }
 0x7b4   :  { %v1403_v43 = vadd.f32 %v1402_v13, %v3584_v54  ;;  %v2681_v46 = vpop.f32.mrb[15].mxu0 }
 0x7b6   :  { %v1416_v53 = vmax.f32 %v1403_v43, 0.0 }
 0x7b7   :  { %v1407_v48 = vpop.f32.mrb[16].mxu0 }
 0x7b8   :  { %v1408_v49 = vadd.f32 %v1407_v48, %v3587_v58  ;;  %v2684_v51 = vpop.f32.mrb[17].mxu0  ;;  %2705 = vmatmul.mubr.msk.f32.vlgmr.msra.gmra.mrb[14].mxu1 %vm351_vm9, %v1416_v53 }
 0x7b9   :  { %2707 = vmatprep.mubr.msk.f32.mxu1 %vm3293_vm7, %v3292_v17  ;;  %2928 = vmatpush3.bf16.msra.mxu1 %v3613_v42 }
 0x7ba   :  { %v1417_v57 = vmax.f32 %v1408_v49, 0.0  ;;  %2930 = vmatprep.subr.bf16.mxu1 %v3615_v47 }
 0x7bb   :  { %v1412_v59 = vpop.f32.mrb[18].mxu0 }
 0x7bc   :  { %v1413_v60 = vadd.f32 %v1412_v59, %v3591_v63  ;;  %v2687_v54 = vpop.f32.mrb[19].mxu0  ;;  %2708 = vmatmul.mubr.msk.f32.gmra.mrb[20].mxu1 %vm351_vm9, %v1417_v57 }
 0x7bd   :  { %2710 = vmatprep.mubr.msk.f32.mxu1 %vm3293_vm7, %v3292_v17  ;;  %2932 = vmatpush3.bf16.msra.mxu1 %v3615_v47 }
 0x7be   :  { %v1418_v58 = vmax.f32 %v1413_v60, 0.0  ;;  %2934 = vmatprep.subr.bf16.mxu1 %v3620_v50 }
 0x7c0   :  { %2711 = vmatmul.mubr.msk.f32.gmra.mrb[22].mxu1 %vm351_vm9, %v1418_v58 }
 0x7c1   :  { %2751 = vmatprep.mubr.msk.f32.mxu1 %vm252_vm8, %v3755_v36 }
 0x7c4   :  { %2752 = vmatmul.mubr.msk.f32.vlgmr.msra.gmra.mrb[24].mxu1 %vm252_vm8, %v3753_v32 }
 0x7c5   :  { %2936 = vmatpush3.bf16.msra.mxu1 %v3620_v50 }
 0x7c6   :  { %2938 = vmatprep.subr.bf16.mxu1 %v3624_v55 }
 0x7c9   :  { %2940 = vmatpush3.bf16.msra.mxu1 %v3624_v55 }
 0x7ca   :  { %2958 = vmatprep.subr.bf16.mxu1 %v3664_v26 }
 0x88b   :  { %v1494_v63 = vpop.f32.mrb[14].mxu1 }
 0x88c   :  { %v1495_v42 = vadd.f32 %v3605_v5, %v1494_v63  ;;  %v2706_v47 = vpop.f32.mrb[15].mxu1 }
 0x88e   :  { %v2351_v61 = vmul.f32 -1.442695, %v1495_v42 }
 0x88f   :  { %v1499_v14 = vpop.f32.mrb[20].mxu1 }
 0x890   :  { %3050 = vpow2.f32 %v2351_v61  ;;  %v1500_v33 = vadd.f32 %v3605_v5, %v1499_v14  ;;  %v2709_v1 = vpop.f32.mrb[21].mxu1 }
 0x892   :  { %v2352_v2 = vmul.f32 -1.442695, %v1500_v33 }
 0x893   :  { %v1504_v3 = vpop.f32.mrb[22].mxu1 }
 0x894   :  { %3052 = vpow2.f32 %v2352_v2  ;;  %v1505_v50 = vadd.f32 %v3605_v5, %v1504_v3  ;;  %v2712_v16 = vpop.f32.mrb[23].mxu1 }
 0x896   :  { %v2353_v4 = vmul.f32 -1.442695, %v1505_v50 }
 0x898   :  { %3054 = vpow2.f32 %v2353_v4 }
 0x89a   :  { %v3051_v55 = vpop.eup %3050 }
 0x89b   :  { %v1517_v27 = vadd.f32 1.0, %v3051_v55 }
 0x89d   :  { %3056 = vrcp.f32 %v1517_v27 }
 0x89e   :  { %v3053_v30 = vpop.eup %3052 }
 0x89f   :  { %v1518_v35 = vadd.f32 1.0, %v3053_v30 }
 0x8a1   :  { %3058 = vrcp.f32 %v1518_v35 }
 0x8a2   :  { %v3055_v10 = vpop.eup %3054 }
 0x8a3   :  { %v1519_v11 = vadd.f32 1.0, %v3055_v10 }
 0x8a5   :  { %3060 = vrcp.f32 %v1519_v11 }
 0x8a7   :  { %v3057_v21 = vpop.eup %3056 }
 0x8a8   :  { %1529 = vrot.lane.b32.xlu0 %v3057_v21, %s3294_s7 }
 0x8ab   :  { %v3059_v22 = vpop.eup %3058 }
 0x8ac   :  { %1531 = vrot.lane.b32.xlu0 %v3059_v22, %s3294_s7 }
 0x8af   :  { %v3061_v28 = vpop.eup %3060 }
 0x8b0   :  { %1533 = vrot.lane.b32.xlu0 %v3061_v28, %s3294_s7 }
 0x91a   :  { %v1530_v5 = vpop.permute.xlu0 %1529 }
 0x91b   :  { %v1538_v31 = vmul.f32 %v1530_v5, %v1495_v42 }
 0x91e   :  { %v1532_v29 = vpop.permute.xlu0 %1531 }
 0x91f   :  { %v1539_v34 = vmul.f32 %v1532_v29, %v1500_v33 }
 0x921   :  { %v1541_v40 = vpack.c.bf16 %v1539_v34, %v1538_v31 }
 0x922   :  { %v1534_v37 = vpop.permute.xlu0 %1533 }
 0x923   :  { %v1540_v44 = vmul.f32 %v1534_v37, %v1505_v50  ;;  %2714 = vmatpush3.bf16.msra.mxu0 %v1541_v40 }
 0x924   :  { %2715 = vmatprep.subr.bf16.mxu0 %v3292_v17 }
 0x925   :  { %v1542_v41 = vpack.c.bf16 %v1540_v44, %v1540_v44 }
 0x927   :  { %v1544_v45 = vsel %vm496_vm10, %v1542_v41, 0 }
 0x928   :  { %2716 = vmatpush3.bf16.msra.mxu0 %v1544_v45 }
 0x929   :  { %2910 = vmatprep.subr.bf16.mxu0 %v3637_v23 }
 0x92b   :  { %2718 = vmatmul.mubr.msk.bf16.vlgmr.msra.gmra.mrb[20].mxu0 %vm492_vm11, %v3643_v9 }
 0x92c   :  { %2912 = vmatpush3.bf16.msra.mxu0 %v3637_v23  ;;  %2729 = vmatprep.mubr.msk.f32.mxu0 %vm252_vm8, %v3755_v36 }
 0x92d   :  { %2914 = vmatprep.subr.bf16.mxu0 %v3641_v6 }
 0x930   :  { %2916 = vmatpush3.bf16.msra.mxu0 %v3641_v6 }
 0x931   :  { %2918 = vmatprep.subr.bf16.mxu0 %v3651_v12 }
 0x933   :  { %2730 = vmatmul.mubr.msk.f32.vlgmr.msra.gmra.mrb[24].mxu0 %vm252_vm8, %v3753_v32 }
 0x934   :  { %2920 = vmatpush3.bf16.msra.mxu0 %v3651_v12 }
 0x935   :  { %2922 = vmatprep.subr.bf16.mxu0 %v3655_v19 }
 0x938   :  { %2924 = vmatpush3.bf16.msra.mxu0 %v3655_v19 }
 0x939   :  { %2942 = vmatprep.subr.bf16.mxu0 %v3662_v24 }
 0x9fe   :  { %v1580_v17 = vpop.f32.mrb[20].mxu0 }
 0x9ff   :  { %v2719_v23 = vpop.f32.mrb[21].mxu0  ;;  %2740 = vmatprep.mubr.msk.f32.mxu0 %vm252_vm8, %v1580_v17  ;;  %2762 = vmatprep.mubr.msk.f32.mxu1 %vm252_vm8, %v1580_v17 }
 0xa00   :  { %v1583_v6 = vpop.f32.mrb[22].mxu0 }
 0xa01   :  { %v2720_v9 = vpop.f32.mrb[23].mxu0  ;;  %2741 = vmatmul.mubr.msk.f32.vlgmr.msra.gmra.mrb[24].mxu0 %vm252_vm8, %v1583_v6  ;;  %2763 = vmatmul.mubr.msk.f32.vlgmr.msra.gmra.mrb[24].mxu1 %vm252_vm8, %v1583_v6 }
 0xa02   :  { %2944 = vmatpush3.bf16.msra.mxu0 %v3662_v24  ;;  %2960 = vmatpush3.bf16.msra.mxu1 %v3664_v26 }
 0xa03   :  { %2773 = vmatprep.mubr.msk.f32.mxu0 %vm252_vm8, %v3755_v36  ;;  %2795 = vmatprep.mubr.msk.f32.mxu1 %vm252_vm8, %v3755_v36 }
 0xa04   :  { %2946 = vmatprep.subr.bf16.mxu0 %v3670_v38  ;;  %2962 = vmatprep.subr.bf16.mxu1 %v3672_v39 }
 0xa06   :  { %2948 = vmatpush3.bf16.msra.mxu0 %v3670_v38  ;;  %2964 = vmatpush3.bf16.msra.mxu1 %v3672_v39 }
 0xa07   :  { %2950 = vmatprep.subr.bf16.mxu0 %v3680_v52  ;;  %2966 = vmatprep.subr.bf16.mxu1 %v3682_v56 }
 0xa09   :  { %2774 = vmatmul.mubr.msk.f32.vlgmr.msra.gmra.mrb[26].mxu0 %vm252_vm8, %v3753_v32  ;;  %2796 = vmatmul.mubr.msk.f32.vlgmr.msra.gmra.mrb[26].mxu1 %vm252_vm8, %v3753_v32 }
 0xa0a   :  { %2952 = vmatpush3.bf16.msra.mxu0 %v3680_v52  ;;  %2784 = vmatprep.mubr.msk.f32.mxu0 %vm252_vm8, %v1580_v17 }
 0xa0b   :  { %2968 = vmatpush3.bf16.msra.mxu1 %v3682_v56  ;;  %2806 = vmatprep.mubr.msk.f32.mxu1 %vm252_vm8, %v1580_v17 }
 0xa0c   :  { %2954 = vmatprep.subr.bf16.mxu0 %v3692_v62  ;;  %2970 = vmatprep.subr.bf16.mxu1 %v3694_v0 }
 0xa0e   :  { %2956 = vmatpush3.bf16.msra.mxu0 %v3692_v62 }
 0xa0f   :  { %2972 = vmatpush3.bf16.msra.mxu1 %v3694_v0 }
 0xa11   :  { %2785 = vmatmul.mubr.msk.f32.vlgmr.msra.gmra.mrb[26].mxu0 %vm252_vm8, %v1583_v6 }
 0xa12   :  { %2807 = vmatmul.mubr.msk.f32.vlgmr.msra.gmra.mrb[26].mxu1 %vm252_vm8, %v1583_v6 }
 0xad4   :  { %v2742_v12 = vpop.f32.mrb[24].mxu0  ;;  %v2764_v19 = vpop.f32.mrb[24].mxu1 }
 0xad5   :  { %v1750_v24 = vadd.f32 %v2742_v12, %v3722_v7  ;;  %v1902_v26 = vadd.f32 %v2764_v19, %v3727_v8  ;;  %v1740_v38 = vpop.f32.mrb[25].mxu0  ;;  %v1892_v39 = vpop.f32.mrb[25].mxu1 }
 0xad6   :  { %v1749_v52 = vadd.f32 %v3722_v7, %v1740_v38  ;;  %v1901_v56 = vadd.f32 %v3727_v8, %v1892_v39 }
 0xad7   :  { %v2372_v32 = vmul.f32 -1.442695, %v1750_v24  ;;  %v2374_v62 = vmul.f32 -1.442695, %v1902_v26 }
 0xad8   :  { %v2371_v36 = vmul.f32 -1.442695, %v1749_v52  ;;  %v2373_v0 = vmul.f32 -1.442695, %v1901_v56 }
 0xad9   :  { %3062 = vpow2.f32 %v2372_v32 }
 0xada   :  { %3064 = vpow2.f32 %v2374_v62 }
 0xadb   :  { %3066 = vpow2.f32 %v2371_v36 }
 0xadc   :  { %3068 = vpow2.f32 %v2373_v0 }
 0xae3   :  { %v3063_v13 = vpop.eup %3062 }
 0xae4   :  { %v3065_v43 = vpop.eup %3064  ;;  %v2214_v46 = vadd.f32 1.0, %v3063_v13  ;;  %v2786_v53 = vpop.f32.mrb[26].mxu0 }
 0xae5   :  { %v3067_v48 = vpop.eup %3066  ;;  %v2226_v49 = vadd.f32 1.0, %v3065_v43  ;;  %v2808_v51 = vpop.f32.mrb[26].mxu1  ;;  %v2054_v8 = vadd.f32 %v2786_v53, %v3736_v18 }
 0xae6   :  { %v2044_v57 = vpop.f32.mrb[27].mxu0  ;;  %v3069_v59 = vpop.eup %3068  ;;  %3070 = vrcp.f32 %v2214_v46  ;;  %v2213_v7 = vadd.f32 1.0, %v3067_v48  ;;  %v2206_v60 = vadd.f32 %v2808_v51, %v3741_v20 }
 0xae7   :  { %v2196_v54 = vpop.f32.mrb[27].mxu1  ;;  %3072 = vrcp.f32 %v2226_v49  ;;  %v2225_v58 = vadd.f32 1.0, %v3069_v59  ;;  %v2053_v47 = vadd.f32 %v3736_v18, %v2044_v57 }
 0xae8   :  { %v2205_v63 = vadd.f32 %v3741_v20, %v2196_v54  ;;  %3074 = vrcp.f32 %v2213_v7  ;;  %v2376_v42 = vmul.f32 -1.442695, %v2206_v60 }
 0xae9   :  { %3076 = vrcp.f32 %v2225_v58 }
 0xaea   :  { %v2375_v61 = vmul.f32 -1.442695, %v2205_v63  ;;  %3078 = vtanh.f32 %v2054_v8 }
 0xaeb   :  { %3080 = vpow2.f32 %v2376_v42 }
 0xaec   :  { %3082 = vtanh.f32 %v2053_v47 }
 0xaed   :  { %3084 = vpow2.f32 %v2375_v61 }
 0xaf0   :  { %v3071_v14 = vpop.eup %3070 }
 0xaf1   :  { %v3073_v33 = vpop.eup %3072 }
 0xaf2   :  { %v3075_v1 = vpop.eup %3074  ;;  %v2246_v3 = vmul.f32 %v3073_v33, %v3747_v15 }
 0xaf3   :  { %v3077_v2 = vpop.eup %3076 }
 0xaf4   :  { %v3079_v50 = vpop.eup %3078  ;;  %v2245_v20 = vmul.f32 %v3077_v2, %v3750_v25 }
 0xaf5   :  { %v3081_v16 = vpop.eup %3080  ;;  %v2248_v4 = vmul.f32 %v3079_v50, %v3071_v14 }
 0xaf6   :  { %v3083_v55 = vpop.eup %3082  ;;  %v2240_v27 = vadd.f32 1.0, %v3081_v16 }
 0xaf7   :  { %v3085_v18 = vpop.eup %3084  ;;  %v2250_v30 = vadd.f32 %v2248_v4, %v2246_v3  ;;  %v2247_v35 = vmul.f32 %v3083_v55, %v3075_v1 }
 0xaf8   :  { %3086 = vrcp.f32 %v2240_v27  ;;  %v2239_v10 = vadd.f32 1.0, %v3085_v18 }
 0xaf9   :  { %3088 = vtanh.f32 %v2250_v30  ;;  %2258 = vst.msk [vmem:[#allocation14 + $0x8] sm:$0xff] %vm252_vm8, %v2250_v30  ;;  %v2249_v11 = vadd.f32 %v2247_v35, %v2245_v20 }
 0xafa   :  { %3090 = vrcp.f32 %v2239_v10 }
 0xafb   :  { %3092 = vtanh.f32 %v2249_v11  ;;  %2257 = vst.msk [vmem:[#allocation14] sm:$0xff] %vm252_vm8, %v2249_v11 }
 0xafc   :  { %3237 = shalt.err (!%p3234_p10)
}
 0xafd   :  { %s3238_s18 = scalar_lea.hbm %s3912_s12, 256 }
 0xafe   :  { %p3239_p11 = scmp.ne.s32.totalorder %s3912_s12, %s3238_s18  ;;  %p3242_p12 = scmp.lt.u32.totalorder %s3238_s18, %s3912_s12 }
 0xb00   :  { %p3244_p13 = pnand %p3242_p12, %p3239_p11 }
 0xb02   :  { %3247 = shalt.err (!%p3244_p13)
}
 0xb03   :  { %2282 = dma.vmem_to_hbm [thread:$0]  %s2277_s1, 256, %s3912_s12, [#allocation15], %s3284_s15, %s3284_s15, %s3285_s16   ;;  %v3087_v15 = vpop.eup %3086 }
 0xb04   :  { %v3089_v25 = vpop.eup %3088  ;;  %s3296_s25 = smov [#allocation13]  }
 0xb05   :  { %s2264_s5 = sshll.u32 %s3296_s25, 4  ;;  %v3091_v21 = vpop.eup %3090  ;;  %v2254_v22 = vmul.f32 %v3089_v25, %v3087_v15  ;;  %s2265_s5 = int_to_ptr.vmem [resolvable:$true] %s2264_s5 }
 0xb06   :  { %v3093_v28 = vpop.eup %3092  ;;  %s3248_s24 = scalar_lea.vmem %s2265_s5, 256  ;;  %p3253_p1 = scmp.lt.s32.totalorder %s2265_s5, %s2265_s5 }
 0xb07   :  { %v2253_v5 = vmul.f32 %v3093_v28, %v3091_v21  ;;  %2256 = vst.msk [vmem:[#allocation13 + $0x8] sm:$0xff] %vm252_vm8, %v2254_v22  ;;  %p3249_p0 = scmp.ne.s32.totalorder %s2265_s5, %s3248_s24  ;;  %p3254_p2 = scmp.lt.s32.totalorder %s3248_s24, %s3248_s24 }
 0xb09   :  { %2255 = vst.msk [vmem:[#allocation13] sm:$0xff] %vm252_vm8, %v2253_v5  ;;  %p3255_p3 = por %p3254_p2, %p3253_p1 }
 0xb0b   :  { %p3256_p4 = pnand %p3255_p3, %p3249_p0 }
 0xb0d   :  { %3259 = shalt.err (!%p3256_p4)
}
 0xb0e   :  { %s3260_s6 = scalar_lea.hbm %s3911_s11, 256 }
 0xb0f   :  { %p3261_p5 = scmp.ne.s32.totalorder %s3911_s11, %s3260_s6  ;;  %p3264_p6 = scmp.lt.u32.totalorder %s3260_s6, %s3911_s11 }
 0xb11   :  { %p3266_p7 = pnand %p3264_p6, %p3261_p5 }
 0xb13   :  { %3269 = shalt.err (!%p3266_p7)
}
 0xb14   :  { %2270 = dma.vmem_to_hbm [thread:$0]  %s2265_s5, 256, %s3911_s11, [#allocation4], %s3284_s15, %s3284_s15, %s3285_s16  }
 0xb15   :  { %3278 = dma.done.wait [#allocation4], 256  }
 0xb16   :  { %3279 = vsyncadd [#allocation4], 4294967040 }
 0xb17   :  { %3280 = dma.done.wait [#allocation15], 256  }
 0xb18   :  { %3281 = vsyncadd [#allocation15], 4294967040 }
 0xb19   :  { %2289 = vsyncpa [#allocation3], 1 }
 0xb1a   :  { %2290 = vsyncpa [#allocation6], 1 }
 0xb1b   :  { %2291 = vsyncpa [#allocation9], 1 }
 0xb1c   :  { %2292 = vsyncpa [#allocation12], 1 }
 0xb1d   :  { %2293 = vsyncpa [#allocation4], 1 }
 0xb1e   :  { %2294 = vsyncpa [#allocation15], 1 }

</bundles_post_ra>
